<compile_context>
chip_gen: v5e
topology: v5e:2x2
jax: 0.10.0
libtpu: 0.0.40
codegen_flags: <defaults>
</compile_context>

<pallas_src>
import jax
import jax.numpy as jnp
from jax.experimental import pallas as pl
from jax.experimental.pallas import tpu as pltpu

_LANE = 128                       # TPU lane width (fast axis of a vreg)
_TARGET_ROWS = 1024               # ~512 KiB f32 per (rows x 128) tile: HBM-roofline knee
_MAX_BATCH_FOLD = 8               # cap on how many batch elements share one block
_TILE_VMEM_BUDGET = 20 * 1024 * 1024
_BYPASS_BYTES = 1 << 20           # below ~1 MiB the pallas_call overhead dominates
_VMEM_LIMIT = 32 * 1024 * 1024


def build_positional_encoding_table(d_model: int, max_len: int = 500) -> jnp.ndarray:
    """Deterministic buffer identical to the PyTorch __init__ (shape (max_len, d_model))."""
    position = jnp.arange(0, max_len, dtype=jnp.float32)[:, None]             # (max_len, 1)
    div_term = jnp.exp(
        jnp.arange(0, d_model, 2, dtype=jnp.float32)
        * (-jnp.log(jnp.float32(10000.0)) / d_model)
    )                                                                          # (ceil(d/2),)
    angles = position * div_term                                               # (max_len, ceil(d/2))
    pe = jnp.zeros((max_len, d_model), dtype=jnp.float32)
    pe = pe.at[:, 0::2].set(jnp.sin(angles))
    # Deliberate deviation: slice cos so odd d_model doesn't shape-mismatch
    # (the original PyTorch code would raise for odd d_model).
    pe = pe.at[:, 1::2].set(jnp.cos(angles[:, : d_model // 2]))
    return pe


def _pe_add_kernel(x_ref, pe_ref, o_ref):
    # x_ref, o_ref: (tB, tR, L); pe_ref: (tR, L). Leading-dim broadcast is free on the VPU.
    o_ref[...] = (x_ref[...] + pe_ref[...][None]).astype(o_ref.dtype)


def _choose_batch_fold(B: int, tR: int, lanes: int, itemsize: int) -> int:
    """Largest tB (divisor of B, <= _MAX_BATCH_FOLD) keeping double-buffered tiles in budget."""
    lanes_pad = -(-lanes // _LANE) * _LANE      # VMEM layout pads to 128 lanes
    rows_pad = -(-tR // 8) * 8                  # and 8 sublanes
    tile_bytes = max(rows_pad * lanes_pad * itemsize, 1)
    # Footprint ~ (2 x-bufs + 2 out-bufs) * tB tiles + 2 pe tiles.
    tB = max(1, min(B, _MAX_BATCH_FOLD, (_TILE_VMEM_BUDGET // tile_bytes - 2) // 4))
    while B % tB:
        tB -= 1
    return tB


def _pe_add_pallas(x3: jnp.ndarray, pe2: jnp.ndarray, donate_x: bool) -> jnp.ndarray:
    """x3: (B, R, L); pe2: (R, L). Returns x3 + pe2[None] via a tiled Pallas kernel."""
    B, R, L = x3.shape
    tR = R if R <= _TARGET_ROWS else _TARGET_ROWS   # full extent, or a 1024-row (8-aligned) tile
    tB = _choose_batch_fold(B, tR, L, x3.dtype.itemsize)

    # Grid order: row tiles outer, batch tiles inner. pe's block index depends only on
    # the row-tile axis, so pe stays resident in VMEM across the inner batch loop
    # (perf-only property; correctness does not depend on iteration order).
    grid = (pl.cdiv(R, tR), B // tB)

    return pl.pallas_call(
        _pe_add_kernel,
        out_shape=jax.ShapeDtypeStruct(x3.shape, x3.dtype),
        grid_spec=pltpu.PrefetchScalarGridSpec(
            num_scalar_prefetch=0,
            grid=grid,
            in_specs=[
                pl.BlockSpec((tB, tR, L), lambda r, b: (b, r, 0)),   # x: tB batch rows per step
                pl.BlockSpec((tR, L), lambda r, b: (r, 0)),          # pe: shared across batch
            ],
            out_specs=pl.BlockSpec((tB, tR, L), lambda r, b: (b, r, 0)),
        ),
        compiler_params=pltpu.CompilerParams(
            # Both axes independent; on v7x they shard across the 2 TensorCores.
            dimension_semantics=("parallel", "parallel"),
            vmem_limit_bytes=_VMEM_LIMIT,
        ),
        # In-place add when the caller (or an internal padded temp) no longer needs x.
        input_output_aliases=({0: 0} if donate_x else {}),
    )(x3, pe2)


def positional_encoding_forward(
    x: jnp.ndarray, pe_table: jnp.ndarray, *, donate_x: bool = False
) -> jnp.ndarray:
    """x: (B, S, D); pe_table: (max_len, D) float32. Returns x + pe_table[:S] broadcast over B.

    Note: pe is cast to x.dtype, so under bf16 activations the add rounds in bf16 and the
    output stays bf16 (the PyTorch module would promote to f32) -- deliberate deviation.
    """
    B, S, D = x.shape
    pe_slice = pe_table[:S, :].astype(x.dtype)   # glue: static slice + dtype match

    # Tiny-problem bypass: XLA-fused add beats pallas_call fixed cost at these sizes.
    if B * S * D * x.dtype.itemsize < _BYPASS_BYTES:
        return x + pe_slice[None]

    flat = S * D
    if flat % _LANE == 0:
        # Lane-dense layout: collapse (S, D) into rows of exactly 128 lanes.
        R = flat // _LANE
        out = _pe_add_pallas(x.reshape(B, R, _LANE), pe_slice.reshape(R, _LANE), donate_x)
        return out.reshape(B, S, D)

    if D < _LANE:
        # Narrow D: pad the flattened per-batch length up to a multiple of 128 so stores
        # are full 128-lane vsts (lane density is the biggest measured store lever).
        # The padded temp is internal and dead after the kernel -> always donate it.
        R = pl.cdiv(flat, _LANE)
        pad = R * _LANE - flat
        x_p = jnp.pad(x.reshape(B, flat), ((0, 0), (0, pad))).reshape(B, R, _LANE)
        pe_p = jnp.pad(pe_slice.reshape(flat), (0, pad)).reshape(R, _LANE)
        out = _pe_add_pallas(x_p, pe_p, donate_x=True)
        return out.reshape(B, R * _LANE)[:, :flat].reshape(B, S, D)

    # D >= 128 but not a multiple of 128: keep D as the (full) lane dim, tile over S.
    # Lane density is already >= 50%; padding would cost extra HBM passes.
    # TODO(synk): could split D into a 128-multiple body + masked tail if this path gets hot.
    return _pe_add_pallas(x, pe_slice, donate_x)


if __name__ == "__main__":
    MAX_LEN = 500
    key = jax.random.PRNGKey(0)

    # --- primary check: small shapes consistent with the module (batch=2, seq=8, d_model=32)
    #     (hits the tiny-problem bypass, as intended for this size)
    B, S, D = 2, 8, 32
    x = jax.random.normal(key, (B, S, D), dtype=jnp.float32)
    pe_table = build_positional_encoding_table(D, MAX_LEN)
    out = jax.block_until_ready(positional_encoding_forward(x, pe_table))
    ref = x + pe_table[None, :S, :]
    assert out.shape == (B, S, D)
    assert jnp.allclose(out, ref, atol=1e-6), "mismatch vs reference (small / bypass case)"

    # --- lane-dense Pallas path with batch folding + donation (R=2048 -> 2 row tiles, tB=2)
    B2, S2, D2 = 2, 256, 1024
    x2 = jax.random.normal(jax.random.PRNGKey(1), (B2, S2, D2), dtype=jnp.float32)
    pe_table2 = build_positional_encoding_table(D2, max_len=S2)
    out2 = jax.block_until_ready(
        positional_encoding_forward(x2, pe_table2, donate_x=True)
    )
    ref2 = x2 + pe_table2[None, :S2, :]
    assert jnp.allclose(out2, ref2, atol=1e-6), "mismatch vs reference (lane-dense case)"

    # --- padded fallback path: D < 128 and S*D not a multiple of 128, large enough for Pallas
    B3, S3, D3 = 2, 3300, 40
    x3 = jax.random.normal(jax.random.PRNGKey(2), (B3, S3, D3), dtype=jnp.float32)
    pe_table3 = build_positional_encoding_table(D3, max_len=S3)
    out3 = jax.block_until_ready(positional_encoding_forward(x3, pe_table3))
    ref3 = x3 + pe_table3[None, :S3, :]
    assert jnp.allclose(out3, ref3, atol=1e-6), "mismatch vs reference (padded fallback case)"

    # --- wide-D fallback path: D >= 128, not a multiple of 128 (D kept as full lane dim)
    B4, S4, D4 = 4, 500, 200
    x4 = jax.random.normal(jax.random.PRNGKey(3), (B4, S4, D4), dtype=jnp.float32)
    pe_table4 = build_positional_encoding_table(D4, MAX_LEN)
    out4 = jax.block_until_ready(positional_encoding_forward(x4, pe_table4))
    ref4 = x4 + pe_table4[None, :S4, :]
    assert jnp.allclose(out4, ref4, atol=1e-6), "mismatch vs reference (wide-D fallback case)"

    print("KERNEL_OK")
</pallas_src>

<mosaic_0001>
module attributes {stable_mosaic.version = 11 : i64} {
  func.func @_pe_add_kernel(%arg0: i32, %arg1: i32, %arg2: memref<2x1024x128xf32, #tpu.memory_space<vmem>>, %arg3: memref<1024x128xf32, #tpu.memory_space<vmem>>, %arg4: memref<2x1024x128xf32, #tpu.memory_space<vmem>>) attributes {dimension_semantics = [#tpu.dimension_semantics<parallel>, #tpu.dimension_semantics<parallel>], iteration_bounds = array<i64: 2, 1>, scalar_prefetch = 0 : i64, scratch_operands = 0 : i64, tpu.core_type = #tpu.core_type<tc>, window_params = [{transform_indices = @transform_0, window_bounds = array<i64: 2, 1024, 128>}, {transform_indices = @transform_1, window_bounds = array<i64: 1024, 128>}, {transform_indices = @transform_2, window_bounds = array<i64: 2, 1024, 128>}]} {
    %c0 = arith.constant 0 : index
    %c0_0 = arith.constant 0 : index
    %c0_1 = arith.constant 0 : index
    %0 = vector.load %arg2[%c0, %c0_0, %c0_1] : memref<2x1024x128xf32, #tpu.memory_space<vmem>>, vector<2x1024x128xf32>
    %c0_2 = arith.constant 0 : index
    %c0_3 = arith.constant 0 : index
    %1 = vector.load %arg3[%c0_2, %c0_3] : memref<1024x128xf32, #tpu.memory_space<vmem>>, vector<1024x128xf32>
    %2 = vector.shape_cast %1 : vector<1024x128xf32> to vector<1x1024x128xf32>
    %3 = vector.broadcast %2 : vector<1x1024x128xf32> to vector<2x1024x128xf32>
    %4 = arith.addf %0, %3 : vector<2x1024x128xf32>
    %c0_4 = arith.constant 0 : index
    %c0_5 = arith.constant 0 : index
    %c0_6 = arith.constant 0 : index
    %5 = vector.load %arg4[%c0_4, %c0_5, %c0_6] : memref<2x1024x128xf32, #tpu.memory_space<vmem>>, vector<2x1024x128xf32>
    tpu.vector_store %arg4[%c0_4, %c0_5, %c0_6], %4 {strides = array<i32>} : memref<2x1024x128xf32, #tpu.memory_space<vmem>>, vector<2x1024x128xf32>,
    return
  }
  func.func @transform_0(%arg0: i32, %arg1: i32) -> (i32, i32, i32) {
    %c0_i32 = arith.constant 0 : i32
    %c0_i32_0 = arith.constant 0 : i32
    return %arg1, %arg0, %c0_i32 : i32, i32, i32
  }
  func.func @transform_1(%arg0: i32, %arg1: i32) -> (i32, i32) {
    %c0_i32 = arith.constant 0 : i32
    %c0_i32_0 = arith.constant 0 : i32
    return %arg0, %c0_i32 : i32, i32
  }
  func.func @transform_2(%arg0: i32, %arg1: i32) -> (i32, i32, i32) {
    %c0_i32 = arith.constant 0 : i32
    %c0_i32_0 = arith.constant 0 : i32
    return %arg1, %arg0, %c0_i32 : i32, i32, i32
  }
}

</mosaic_0001>

<bundles_post_ra>
// kernel: tpu_custom_call.1
= control target key start
LH: loop header
LB: loop body
LE: loop exit
PB: predicated region body
PF: predicated region fallthrough
CT: control target
= control target key end

     0   :  { %7 = vsyncpa [#allocation3], 0  ;;  %s2749_s0 = inlined_call_operand.hbm [shape: f32[2,2048,128], index: 0, kind: input, shape index: {}, may-alias: {0,2}]   ;;  %s2750_s1 = inlined_call_operand.vmem [shape: f32[2048,128], index: 1, kind: input, shape index: {}]   ;;  %s2751_s2 = inlined_call_operand.hbm [shape: f32[2,2048,128], index: 2, kind: output, shape index: {}, may-alias: {0,2}]  }
   0x1   :  { %9 = vsyncpa [#allocation3 + $0x1], 0 }
   0x2   :  { %10 = vsyncpa [#allocation4], 0 }
   0x3   :  { %12 = vsyncpa [#allocation4 + $0x1], 0  ;;  %s1459_s9 = smov 0   ;;  %s1461_s10 = smov 0  }
   0x4   :  { %s1463_s11 = smov 0   ;;  %s1465_s12 = smov 0  }
   0x5   :  { %s1467_s13 = smov 0   ;;  %s1469_s14 = smov 0  }
   0x6 LB: > { %s1271_s15 = sadd.s32 4294967295, %s1431_s14   ;;  %s1272_s16 = sadd.s32 4294967294, %s1431_s14   ;;  %s1431_s14 = sphi %s1469_s14, %s18_s14   ;;  %s1427_s13 = sphi %s1467_s13, %s2988_s13   ;;  %s1423_s12 = sphi %s1465_s12, %s2987_s12   ;;  %s1419_s11 = sphi %s1463_s11, %s2986_s11   ;;  %s1415_s10 = sphi %s1461_s10, %s2985_s10   ;;  %s1411_s9 = sphi %s1459_s9, %s2984_s9  }
   0x7   : > { %s30_s17 = sadd.s32 1, %s1427_s13  ;;  %s39_s18 = sadd.s32 1, %s1419_s11 }
   0x8   : > { %p32_p0 = scmp.ge.s32.totalorder %s30_s17, 2  ;;  %p46_p1 = scmp.ne.s32.totalorder %s1419_s11, %s1415_s10 }
   0x9   : > { %p47_p2 = scmp.eq.s32.totalorder %s1431_s14, 0  ;;  %p52_p3 = scmp.ne.s32.totalorder %s1415_s10, %s1411_s9 }
   0xa   : > { %s2990_s17 = smov (%p32_p0, %s30_s17), 0  ;;  %p53_p5 = scmp.eq.s32.totalorder %s1271_s15, 0 }
   0xb   : > { %p1500_p4 = por %p47_p2, %p46_p1  ;;  %s35_s20 = ssub.s32 %s1427_s13, %s2990_s17 }
   0xc   : > { %p104_p6 = scmp.eq.s32.totalorder %s1271_s15, 1  ;;  %p37_p7 = scmp.eq.s32.totalorder %s35_s20, 0 }
   0xd   : > { %p1506_p8 = por %p53_p5, %p52_p3  ;;  %p110_p10 = scmp.eq.s32.totalorder %s1272_s16, 1 }
   0xe   : > { %p1510_p9 = por %p104_p6, %p46_p1  ;;  %p1274_p12 = scmp.ge.s32.totalorder %s1431_s14, 2 }
   0xf   : > { %s1515_s23 = scalar_select %p37_p7, %s1419_s11, %s39_s18  }
  0x10   : > { %p1517_p11 = por %p110_p10, %p52_p3  ;;  %126 = sbr.rel (%p1274_p12) target bundleno = 34 (0x22), region = 16 }
  0x15   : > { %s130_s25 = sand.u32 1, %s1419_s11   ;;  %s1290_s26 = sshll.u32 %s1427_s13, 10 }
  0x16   : > { %s1275_s27 = sshll.u32 %s130_s25, 11  ;;  %s142_s30 = scalar_lea.hbm %s2749_s0, %s1290_s26 }
  0x17   : > { %s1292_s3 = scalar_select %p1500_p4, [#allocation0], [#allocation10] }
  0x18   : > { %s155_s4 = sshll.u32 %s142_s30, 4  ;;  %s134_s5 = scalar_lea.vmem [#allocation2], %s1275_s27  ;;  %s156_s4 = int_to_ptr.hbm [resolvable:$true] %s155_s4 }
  0x19   : > { %s157_s6 = sshll.u32 %s134_s5, 4  ;;  %s147_s7 = sld [smem:[%s1292_s3]]   ;;  %s158_s6 = int_to_ptr.vmem [resolvable:$true] %s157_s6 }
  0x1a   : > { %s1433_s8 = smov 32768   ;;  %s1434_s15 = smov 16384  }
  0x1b   : > { %1293 = sst [smem:[#allocation7]] (%p1500_p4), %s1433_s8  ;;  %s1435_s16 = smov 128  }
  0x1c   : > { %1294 = sst [smem:[#allocation7 + $0x1]] (%p1500_p4), %s1434_s15  ;;  %s1436_s26 = smov 8  }
  0x1d   : > { %1295 = sst [smem:[#allocation7 + $0x2]] (%p1500_p4), %s1435_s16  ;;  %s131_s27 = scalar_lea.sflag [#allocation3], %s130_s25 }
  0x1e   : > { %1296 = sst [smem:[#allocation7 + $0x3]] (%p1500_p4), %s1435_s16  ;;  %s1437_s28 = smov [#allocation6]  }
  0x1f   : > { %s1278_s18 = sshll.u32 %s147_s7, 26  ;;  %1297 = sst [smem:[#allocation7 + $0x4]] (%p1500_p4), %s1435_s16 }
  0x20   : > { %s1279_s20 = sadd.s32 134217728, %s1278_s18  ;;  %1298 = sst [smem:[#allocation7 + $0x5]] (%p1500_p4), %s1436_s26 }
  0x21   : > { %1299 = dma.general (%p1500_p4), %s156_s4, 32768, %s158_s6, %s131_s27, %s1437_s28, [#allocation7], %s1279_s20, 0  }
  0x22 PF: > { %p1280_p13 = scmp.ge.s32.totalorder %s1431_s14, 1  ;;  %p187_p0 = scmp.lt.s32.totalorder %s1431_s14, 3 }
  0x24   : > { %p188_p1 = pnand %p1280_p13, %p187_p0 }
  0x26   : > { %191 = sbr.rel (%p188_p1) target bundleno = 398 (0x18e), region = 28 }
  0x2b   : > { %s1548_s29 = sand.u32 1, %s1415_s10  }
  0x2c   : > { %s1281_s30 = sshll.u32 %s1548_s29, 11  ;;  %s194_s3 = scalar_lea.sflag [#allocation3], %s1548_s29 }
  0x2d   : > { %s1552_s5 = scalar_lea.vmem [#allocation2], %s1281_s30 }
  0x2e   : > { %1402 = dma.done.wait (%p1506_p8), %s194_s3, 32768  }
  0x2f   : > { %1404 = vsyncadd (%p1506_p8), %s194_s3, 4294934528  ;;  %s1283_s19 = sshll.u32 %s1423_s12, 7  ;;  %v234_v0 = vld [vmem:[%s1552_s5] sm:$0xff]  ;;  %v235_v2 = vld [vmem:[%s1552_s5 + $0x8] sm:$0xff]  ;;  %s1573_s21 = scalar_lea.vmem [#allocation5], %s1281_s30 }
  0x30   : > { %p227_p2 = scmp.lt.s32.totalorder %s1283_s19, 255  ;;  %v236_v5 = vld [vmem:[%s1552_s5 + $0x10] sm:$0xff]  ;;  %v237_v9 = vld [vmem:[%s1552_s5 + $0x18] sm:$0xff]  ;;  %v238_v11 = vld [vmem:[%s1552_s5 + $0x20] sm:$0xff]  ;;  %s1131_s8 = scalar_lea.sflag [#allocation4], %s1548_s29 }
  0x31   : > { %v239_v14 = vld [vmem:[%s1552_s5 + $0x28] sm:$0xff]  ;;  %v240_v18 = vld [vmem:[%s1552_s5 + $0x30] sm:$0xff]  ;;  %v241_v20 = vld [vmem:[%s1552_s5 + $0x38] sm:$0xff] }
  0x32   : > { %s2992_s19 = smov (!%p227_p2, %s1283_s19), 255  ;;  %v242_v23 = vld [vmem:[%s1552_s5 + $0x40] sm:$0xff]  ;;  %v243_v26 = vld [vmem:[%s1552_s5 + $0x48] sm:$0xff]  ;;  %v244_v28 = vld [vmem:[%s1552_s5 + $0x50] sm:$0xff] }
  0x33   : > { %s1284_s25 = sshll.u32 %s2992_s19, 3  ;;  %v245_v31 = vld [vmem:[%s1552_s5 + $0x58] sm:$0xff]  ;;  %v246_v34 = vld [vmem:[%s1552_s5 + $0x60] sm:$0xff]  ;;  %v247_v37 = vld [vmem:[%s1552_s5 + $0x68] sm:$0xff] }
  0x34   : > { %s1562_s7 = scalar_lea.vmem %s2750_s1, %s1284_s25  ;;  %v248_v40 = vld [vmem:[%s1552_s5 + $0x70] sm:$0xff]  ;;  %v249_v43 = vld [vmem:[%s1552_s5 + $0x78] sm:$0xff]  ;;  %v250_v46 = vld [vmem:[%s1552_s5 + $0x80] sm:$0xff] }
  0x35   : > { %v490_v1 = vld [vmem:[%s1562_s7] sm:$0xff]  ;;  %v491_v4 = vld [vmem:[%s1562_s7 + $0x8] sm:$0xff]  ;;  %v492_v6 = vld [vmem:[%s1562_s7 + $0x10] sm:$0xff] }
  0x36   : > { %v618_v3 = vadd.f32 %v490_v1, %v234_v0  ;;  %v619_v7 = vadd.f32 %v491_v4, %v235_v2  ;;  %v620_v8 = vadd.f32 %v492_v6, %v236_v5  ;;  %v493_v10 = vld [vmem:[%s1562_s7 + $0x18] sm:$0xff]  ;;  %v1577_v13 = vld [vmem:[%s1562_s7 + $0x20] sm:$0xff]  ;;  %v1581_v15 = vld [vmem:[%s1562_s7 + $0x28] sm:$0xff] }
  0x37   : > { %v621_v12 = vadd.f32 %v493_v10, %v237_v9  ;;  %v622_v16 = vadd.f32 %v1577_v13, %v238_v11  ;;  %v623_v17 = vadd.f32 %v1581_v15, %v239_v14  ;;  %v1588_v19 = vld [vmem:[%s1562_s7 + $0x30] sm:$0xff]  ;;  %v1594_v22 = vld [vmem:[%s1562_s7 + $0x38] sm:$0xff]  ;;  %v1598_v24 = vld [vmem:[%s1562_s7 + $0x40] sm:$0xff] }
  0x38   : > { %874 = vst [vmem:[%s1573_s21] sm:$0xff] %v618_v3  ;;  %v624_v21 = vadd.f32 %v1588_v19, %v240_v18  ;;  %v625_v25 = vadd.f32 %v1594_v22, %v241_v20  ;;  %v1604_v27 = vld [vmem:[%s1562_s7 + $0x48] sm:$0xff]  ;;  %v626_v29 = vadd.f32 %v1598_v24, %v242_v23  ;;  %v1610_v30 = vld [vmem:[%s1562_s7 + $0x50] sm:$0xff]  ;;  %v1614_v32 = vld [vmem:[%s1562_s7 + $0x58] sm:$0xff] }
  0x39   : > { %875 = vst [vmem:[%s1573_s21 + $0x8] sm:$0xff] %v619_v7  ;;  %v627_v33 = vadd.f32 %v1604_v27, %v243_v26  ;;  %v1620_v35 = vld [vmem:[%s1562_s7 + $0x60] sm:$0xff]  ;;  %v628_v36 = vadd.f32 %v1610_v30, %v244_v28  ;;  %v1626_v38 = vld [vmem:[%s1562_s7 + $0x68] sm:$0xff]  ;;  %v629_v39 = vadd.f32 %v1614_v32, %v245_v31  ;;  %v1632_v41 = vld [vmem:[%s1562_s7 + $0x70] sm:$0xff] }
  0x3a   : > { %876 = vst [vmem:[%s1573_s21 + $0x10] sm:$0xff] %v620_v8  ;;  %v630_v42 = vadd.f32 %v1620_v35, %v246_v34  ;;  %v1638_v44 = vld [vmem:[%s1562_s7 + $0x78] sm:$0xff]  ;;  %v631_v45 = vadd.f32 %v1626_v38, %v247_v37  ;;  %v1644_v47 = vld [vmem:[%s1562_s7 + $0x80] sm:$0xff]  ;;  %v632_v48 = vadd.f32 %v1632_v41, %v248_v40  ;;  %v251_v49 = vld [vmem:[%s1552_s5 + $0x88] sm:$0xff] }
  0x3b   : > { %877 = vst [vmem:[%s1573_s21 + $0x18] sm:$0xff] %v621_v12  ;;  %v1650_v50 = vld [vmem:[%s1562_s7 + $0x88] sm:$0xff]  ;;  %v633_v51 = vadd.f32 %v1638_v44, %v249_v43  ;;  %v252_v52 = vld [vmem:[%s1552_s5 + $0x90] sm:$0xff]  ;;  %v634_v54 = vadd.f32 %v1644_v47, %v250_v46  ;;  %v253_v55 = vld [vmem:[%s1552_s5 + $0x98] sm:$0xff] }
  0x3c   : > { %878 = vst [vmem:[%s1573_s21 + $0x20] sm:$0xff] %v622_v16  ;;  %v1656_v53 = vld [vmem:[%s1562_s7 + $0x90] sm:$0xff]  ;;  %v1662_v56 = vld [vmem:[%s1562_s7 + $0x98] sm:$0xff]  ;;  %v635_v57 = vadd.f32 %v1650_v50, %v251_v49  ;;  %v254_v58 = vld [vmem:[%s1552_s5 + $0xa0] sm:$0xff] }
  0x3d   : > { %879 = vst [vmem:[%s1573_s21 + $0x28] sm:$0xff] %v623_v17  ;;  %v1668_v59 = vld [vmem:[%s1562_s7 + $0xa0] sm:$0xff]  ;;  %v636_v60 = vadd.f32 %v1656_v53, %v252_v52  ;;  %v255_v61 = vld [vmem:[%s1552_s5 + $0xa8] sm:$0xff]  ;;  %v637_v63 = vadd.f32 %v1662_v56, %v253_v55  ;;  %v256_v0 = vld [vmem:[%s1552_s5 + $0xb0] sm:$0xff] }
  0x3e   : > { %880 = vst [vmem:[%s1573_s21 + $0x30] sm:$0xff] %v624_v21  ;;  %v1674_v62 = vld [vmem:[%s1562_s7 + $0xa8] sm:$0xff]  ;;  %v1680_v1 = vld [vmem:[%s1562_s7 + $0xb0] sm:$0xff]  ;;  %v638_v2 = vadd.f32 %v1668_v59, %v254_v58  ;;  %v257_v3 = vld [vmem:[%s1552_s5 + $0xb8] sm:$0xff] }
  0x3f   : > { %881 = vst [vmem:[%s1573_s21 + $0x38] sm:$0xff] %v625_v25  ;;  %v1686_v4 = vld [vmem:[%s1562_s7 + $0xb8] sm:$0xff]  ;;  %v639_v5 = vadd.f32 %v1674_v62, %v255_v61  ;;  %v258_v6 = vld [vmem:[%s1552_s5 + $0xc0] sm:$0xff]  ;;  %v640_v8 = vadd.f32 %v1680_v1, %v256_v0  ;;  %v259_v9 = vld [vmem:[%s1552_s5 + $0xc8] sm:$0xff] }
  0x40   : > { %882 = vst [vmem:[%s1573_s21 + $0x40] sm:$0xff] %v626_v29  ;;  %v1692_v7 = vld [vmem:[%s1562_s7 + $0xc0] sm:$0xff]  ;;  %v1698_v10 = vld [vmem:[%s1562_s7 + $0xc8] sm:$0xff]  ;;  %v641_v11 = vadd.f32 %v1686_v4, %v257_v3  ;;  %v260_v12 = vld [vmem:[%s1552_s5 + $0xd0] sm:$0xff] }
  0x41   : > { %883 = vst [vmem:[%s1573_s21 + $0x48] sm:$0xff] %v627_v33  ;;  %v1704_v14 = vld [vmem:[%s1562_s7 + $0xd0] sm:$0xff]  ;;  %v642_v16 = vadd.f32 %v1692_v7, %v258_v6  ;;  %v261_v17 = vld [vmem:[%s1552_s5 + $0xd8] sm:$0xff]  ;;  %v643_v20 = vadd.f32 %v1698_v10, %v259_v9  ;;  %v262_v21 = vld [vmem:[%s1552_s5 + $0xe0] sm:$0xff] }
  0x42   : > { %884 = vst [vmem:[%s1573_s21 + $0x50] sm:$0xff] %v628_v36  ;;  %v1710_v18 = vld [vmem:[%s1562_s7 + $0xd8] sm:$0xff]  ;;  %v1716_v23 = vld [vmem:[%s1562_s7 + $0xe0] sm:$0xff]  ;;  %v644_v25 = vadd.f32 %v1704_v14, %v260_v12  ;;  %v263_v26 = vld [vmem:[%s1552_s5 + $0xe8] sm:$0xff] }
  0x43   : > { %885 = vst [vmem:[%s1573_s21 + $0x58] sm:$0xff] %v629_v39  ;;  %v1722_v28 = vld [vmem:[%s1562_s7 + $0xe8] sm:$0xff]  ;;  %v645_v29 = vadd.f32 %v1710_v18, %v261_v17  ;;  %v264_v31 = vld [vmem:[%s1552_s5 + $0xf0] sm:$0xff]  ;;  %v646_v34 = vadd.f32 %v1716_v23, %v262_v21  ;;  %v265_v36 = vld [vmem:[%s1552_s5 + $0xf8] sm:$0xff] }
  0x44   : > { %886 = vst [vmem:[%s1573_s21 + $0x60] sm:$0xff] %v630_v42  ;;  %v1728_v33 = vld [vmem:[%s1562_s7 + $0xf0] sm:$0xff]  ;;  %v1734_v37 = vld [vmem:[%s1562_s7 + $0xf8] sm:$0xff]  ;;  %v647_v39 = vadd.f32 %v1722_v28, %v263_v26  ;;  %v266_v40 = vld [vmem:[%s1552_s5 + $0x100] sm:$0xff] }
  0x45   : > { %887 = vst [vmem:[%s1573_s21 + $0x68] sm:$0xff] %v631_v45  ;;  %v1740_v42 = vld [vmem:[%s1562_s7 + $0x100] sm:$0xff]  ;;  %v648_v43 = vadd.f32 %v1728_v33, %v264_v31  ;;  %v267_v45 = vld [vmem:[%s1552_s5 + $0x108] sm:$0xff]  ;;  %v268_v49 = vld [vmem:[%s1552_s5 + $0x110] sm:$0xff] }
  0x46   : > { %888 = vst [vmem:[%s1573_s21 + $0x70] sm:$0xff] %v632_v48  ;;  %v1746_v46 = vld [vmem:[%s1562_s7 + $0x108] sm:$0xff]  ;;  %v649_v48 = vadd.f32 %v1734_v37, %v265_v36  ;;  %v650_v52 = vadd.f32 %v1740_v42, %v266_v40  ;;  %v1758_v55 = vld [vmem:[%s1562_s7 + $0x118] sm:$0xff]  ;;  %v270_v58 = vld [vmem:[%s1552_s5 + $0x120] sm:$0xff] }
  0x47   : > { %889 = vst [vmem:[%s1573_s21 + $0x78] sm:$0xff] %v633_v51  ;;  %v1752_v51 = vld [vmem:[%s1562_s7 + $0x110] sm:$0xff]  ;;  %v1770_v0 = vld [vmem:[%s1562_s7 + $0x128] sm:$0xff]  ;;  %v1782_v9 = vld [vmem:[%s1562_s7 + $0x138] sm:$0xff] }
  0x48   : > { %890 = vst [vmem:[%s1573_s21 + $0x80] sm:$0xff] %v634_v54  ;;  %v269_v54 = vld [vmem:[%s1552_s5 + $0x118] sm:$0xff]  ;;  %v652_v61 = vadd.f32 %v1752_v51, %v268_v49  ;;  %v272_v3 = vld [vmem:[%s1552_s5 + $0x130] sm:$0xff]  ;;  %v274_v12 = vld [vmem:[%s1552_s5 + $0x140] sm:$0xff] }
  0x49   : > { %891 = vst [vmem:[%s1573_s21 + $0x88] sm:$0xff] %v635_v57  ;;  %v651_v57 = vadd.f32 %v1746_v46, %v267_v45  ;;  %v1794_v21 = vld [vmem:[%s1562_s7 + $0x148] sm:$0xff]  ;;  %v276_v26 = vld [vmem:[%s1552_s5 + $0x150] sm:$0xff]  ;;  %v1806_v36 = vld [vmem:[%s1562_s7 + $0x158] sm:$0xff] }
  0x4a   : > { %892 = vst [vmem:[%s1573_s21 + $0x90] sm:$0xff] %v636_v60  ;;  %v1764_v60 = vld [vmem:[%s1562_s7 + $0x120] sm:$0xff]  ;;  %v1818_v49 = vld [vmem:[%s1562_s7 + $0x168] sm:$0xff] }
  0x4b   : > { %893 = vst [vmem:[%s1573_s21 + $0x98] sm:$0xff] %v637_v63  ;;  %v271_v63 = vld [vmem:[%s1552_s5 + $0x128] sm:$0xff]  ;;  %v654_v6 = vadd.f32 %v1764_v60, %v270_v58  ;;  %v278_v40 = vld [vmem:[%s1552_s5 + $0x160] sm:$0xff] }
  0x4c   : > { %894 = vst [vmem:[%s1573_s21 + $0xa0] sm:$0xff] %v638_v2  ;;  %v653_v2 = vadd.f32 %v1758_v55, %v269_v54  ;;  %v280_v54 = vld [vmem:[%s1552_s5 + $0x170] sm:$0xff] }
  0x4d   : > { %895 = vst [vmem:[%s1573_s21 + $0xa8] sm:$0xff] %v639_v5  ;;  %v1776_v5 = vld [vmem:[%s1562_s7 + $0x130] sm:$0xff] }
  0x4e   : > { %896 = vst [vmem:[%s1573_s21 + $0xb0] sm:$0xff] %v640_v8  ;;  %v273_v8 = vld [vmem:[%s1552_s5 + $0x138] sm:$0xff]  ;;  %v656_v17 = vadd.f32 %v1776_v5, %v272_v3  ;;  %v282_v3 = vld [vmem:[%s1552_s5 + $0x180] sm:$0xff] }
  0x4f   : > { %897 = vst [vmem:[%s1573_s21 + $0xb8] sm:$0xff] %v641_v11  ;;  %v655_v11 = vadd.f32 %v1770_v0, %v271_v63  ;;  %v1830_v63 = vld [vmem:[%s1562_s7 + $0x178] sm:$0xff] }
  0x50   : > { %898 = vst [vmem:[%s1573_s21 + $0xc0] sm:$0xff] %v642_v16  ;;  %v1788_v16 = vld [vmem:[%s1562_s7 + $0x140] sm:$0xff] }
  0x51   : > { %899 = vst [vmem:[%s1573_s21 + $0xc8] sm:$0xff] %v643_v20  ;;  %v275_v20 = vld [vmem:[%s1552_s5 + $0x148] sm:$0xff]  ;;  %v658_v31 = vadd.f32 %v1788_v16, %v274_v12 }
  0x52   : > { %900 = vst [vmem:[%s1573_s21 + $0xd0] sm:$0xff] %v644_v25  ;;  %v657_v25 = vadd.f32 %v1782_v9, %v273_v8  ;;  %v1842_v12 = vld [vmem:[%s1562_s7 + $0x188] sm:$0xff] }
  0x53   : > { %901 = vst [vmem:[%s1573_s21 + $0xd8] sm:$0xff] %v645_v29  ;;  %v1800_v29 = vld [vmem:[%s1562_s7 + $0x150] sm:$0xff] }
  0x54   : > { %902 = vst [vmem:[%s1573_s21 + $0xe0] sm:$0xff] %v646_v34  ;;  %v277_v34 = vld [vmem:[%s1552_s5 + $0x158] sm:$0xff]  ;;  %v660_v45 = vadd.f32 %v1800_v29, %v276_v26 }
  0x55   : > { %903 = vst [vmem:[%s1573_s21 + $0xe8] sm:$0xff] %v647_v39  ;;  %v659_v39 = vadd.f32 %v1794_v21, %v275_v20  ;;  %v284_v20 = vld [vmem:[%s1552_s5 + $0x190] sm:$0xff] }
  0x56   : > { %904 = vst [vmem:[%s1573_s21 + $0xf0] sm:$0xff] %v648_v43  ;;  %v1812_v43 = vld [vmem:[%s1562_s7 + $0x160] sm:$0xff] }
  0x57   : > { %905 = vst [vmem:[%s1573_s21 + $0xf8] sm:$0xff] %v649_v48  ;;  %v279_v48 = vld [vmem:[%s1552_s5 + $0x168] sm:$0xff]  ;;  %v662_v58 = vadd.f32 %v1812_v43, %v278_v40  ;;  %v286_v40 = vld [vmem:[%s1552_s5 + $0x1a0] sm:$0xff] }
  0x58   : > { %906 = vst [vmem:[%s1573_s21 + $0x100] sm:$0xff] %v650_v52  ;;  %v661_v52 = vadd.f32 %v1806_v36, %v277_v34  ;;  %v1854_v34 = vld [vmem:[%s1562_s7 + $0x198] sm:$0xff] }
  0x59   : > { %907 = vst [vmem:[%s1573_s21 + $0x108] sm:$0xff] %v651_v57  ;;  %v1824_v57 = vld [vmem:[%s1562_s7 + $0x170] sm:$0xff] }
  0x5a   : > { %908 = vst [vmem:[%s1573_s21 + $0x110] sm:$0xff] %v652_v61  ;;  %v281_v61 = vld [vmem:[%s1552_s5 + $0x178] sm:$0xff]  ;;  %v664_v8 = vadd.f32 %v1824_v57, %v280_v54  ;;  %v1866_v54 = vld [vmem:[%s1562_s7 + $0x1a8] sm:$0xff] }
  0x5b   : > { %909 = vst [vmem:[%s1573_s21 + $0x118] sm:$0xff] %v653_v2  ;;  %v663_v2 = vadd.f32 %v1818_v49, %v279_v48 }
  0x5c   : > { %910 = vst [vmem:[%s1573_s21 + $0x120] sm:$0xff] %v654_v6  ;;  %v1836_v6 = vld [vmem:[%s1562_s7 + $0x180] sm:$0xff] }
  0x5d   : > { %911 = vst [vmem:[%s1573_s21 + $0x128] sm:$0xff] %v655_v11  ;;  %v283_v11 = vld [vmem:[%s1552_s5 + $0x188] sm:$0xff]  ;;  %v666_v26 = vadd.f32 %v1836_v6, %v282_v3 }
  0x5e   : > { %912 = vst [vmem:[%s1573_s21 + $0x130] sm:$0xff] %v656_v17  ;;  %v665_v17 = vadd.f32 %v1830_v63, %v281_v61  ;;  %v288_v61 = vld [vmem:[%s1552_s5 + $0x1b0] sm:$0xff] }
  0x5f   : > { %913 = vst [vmem:[%s1573_s21 + $0x138] sm:$0xff] %v657_v25  ;;  %v1848_v25 = vld [vmem:[%s1562_s7 + $0x190] sm:$0xff] }
  0x60   : > { %914 = vst [vmem:[%s1573_s21 + $0x140] sm:$0xff] %v658_v31  ;;  %v285_v31 = vld [vmem:[%s1552_s5 + $0x198] sm:$0xff]  ;;  %v668_v48 = vadd.f32 %v1848_v25, %v284_v20  ;;  %v290_v20 = vld [vmem:[%s1552_s5 + $0x1c0] sm:$0xff] }
  0x61   : > { %915 = vst [vmem:[%s1573_s21 + $0x148] sm:$0xff] %v659_v39  ;;  %v667_v39 = vadd.f32 %v1842_v12, %v283_v11  ;;  %v1878_v11 = vld [vmem:[%s1562_s7 + $0x1b8] sm:$0xff] }
  0x62   : > { %916 = vst [vmem:[%s1573_s21 + $0x150] sm:$0xff] %v660_v45  ;;  %v1860_v45 = vld [vmem:[%s1562_s7 + $0x1a0] sm:$0xff] }
  0x63   : > { %917 = vst [vmem:[%s1573_s21 + $0x158] sm:$0xff] %v661_v52  ;;  %v287_v52 = vld [vmem:[%s1552_s5 + $0x1a8] sm:$0xff]  ;;  %v670_v3 = vadd.f32 %v1860_v45, %v286_v40 }
  0x64   : > { %918 = vst [vmem:[%s1573_s21 + $0x160] sm:$0xff] %v662_v58  ;;  %v669_v58 = vadd.f32 %v1854_v34, %v285_v31  ;;  %v1884_v31 = vld [vmem:[%s1562_s7 + $0x1c0] sm:$0xff]  ;;  %v1890_v40 = vld [vmem:[%s1562_s7 + $0x1c8] sm:$0xff] }
  0x65   : > { %2832 = vst [vmem:[#allocation13_spill] sm:$0xff] %v1854_v34  ;;  %v291_v34 = vld [vmem:[%s1552_s5 + $0x1c8] sm:$0xff] }
  0x66   : > { %919 = vst [vmem:[%s1573_s21 + $0x168] sm:$0xff] %v663_v2  ;;  %v1872_v2 = vld [vmem:[%s1562_s7 + $0x1b0] sm:$0xff] }
  0x67   : > { %2833 = vst [vmem:[#allocation14_spill] sm:$0xff] %v1860_v45  ;;  %v292_v45 = vld [vmem:[%s1552_s5 + $0x1d0] sm:$0xff] }
  0x68   : > { %920 = vst [vmem:[%s1573_s21 + $0x170] sm:$0xff] %v664_v8  ;;  %v289_v8 = vld [vmem:[%s1552_s5 + $0x1b8] sm:$0xff] }
  0x69   : > { %2834 = vst [vmem:[#allocation15_spill] sm:$0xff] %v1866_v54 }
  0x6a   : > { %921 = vst [vmem:[%s1573_s21 + $0x178] sm:$0xff] %v665_v17  ;;  %v671_v17 = vadd.f32 %v1866_v54, %v287_v52  ;;  %v1896_v52 = vld [vmem:[%s1562_s7 + $0x1d0] sm:$0xff]  ;;  %v293_v54 = vld [vmem:[%s1552_s5 + $0x1d8] sm:$0xff] }
  0x6b   : > { %2835 = vst [vmem:[#allocation16_spill] sm:$0xff] %v1872_v2 }
  0x6c   : > { %922 = vst [vmem:[%s1573_s21 + $0x180] sm:$0xff] %v666_v26  ;;  %v672_v26 = vadd.f32 %v1872_v2, %v288_v61  ;;  %v1902_v61 = vld [vmem:[%s1562_s7 + $0x1d8] sm:$0xff]  ;;  %v294_v2 = vld [vmem:[%s1552_s5 + $0x1e0] sm:$0xff] }
  0x6d   : > { %2836 = vst [vmem:[#allocation17_spill] sm:$0xff] %v1878_v11 }
  0x6e   : > { %923 = vst [vmem:[%s1573_s21 + $0x188] sm:$0xff] %v667_v39  ;;  %v673_v39 = vadd.f32 %v1878_v11, %v289_v8  ;;  %v1908_v8 = vld [vmem:[%s1562_s7 + $0x1e0] sm:$0xff]  ;;  %v295_v11 = vld [vmem:[%s1552_s5 + $0x1e8] sm:$0xff] }
  0x6f   : > { %2837 = vst [vmem:[#allocation18_spill] sm:$0xff] %v1884_v31 }
  0x70   : > { %924 = vst [vmem:[%s1573_s21 + $0x190] sm:$0xff] %v668_v48  ;;  %v674_v48 = vadd.f32 %v1884_v31, %v290_v20  ;;  %v1914_v20 = vld [vmem:[%s1562_s7 + $0x1e8] sm:$0xff]  ;;  %v296_v31 = vld [vmem:[%s1552_s5 + $0x1f0] sm:$0xff] }
  0x71   : > { %2838 = vst [vmem:[#allocation19_spill] sm:$0xff] %v1890_v40 }
  0x72   : > { %925 = vst [vmem:[%s1573_s21 + $0x198] sm:$0xff] %v669_v58  ;;  %v675_v58 = vadd.f32 %v1890_v40, %v291_v34  ;;  %v1920_v34 = vld [vmem:[%s1562_s7 + $0x1f0] sm:$0xff]  ;;  %v297_v40 = vld [vmem:[%s1552_s5 + $0x1f8] sm:$0xff] }
  0x73   : > { %2839 = vst [vmem:[#allocation20_spill] sm:$0xff] %v1896_v52 }
  0x74   : > { %926 = vst [vmem:[%s1573_s21 + $0x1a0] sm:$0xff] %v670_v3  ;;  %v676_v3 = vadd.f32 %v1896_v52, %v292_v45  ;;  %v1926_v45 = vld [vmem:[%s1562_s7 + $0x1f8] sm:$0xff]  ;;  %v298_v52 = vld [vmem:[%s1552_s5 + $0x200] sm:$0xff] }
  0x75   : > { %2840 = vst [vmem:[#allocation21_spill] sm:$0xff] %v1902_v61 }
  0x76   : > { %927 = vst [vmem:[%s1573_s21 + $0x1a8] sm:$0xff] %v671_v17  ;;  %v677_v17 = vadd.f32 %v1902_v61, %v293_v54  ;;  %v1932_v54 = vld [vmem:[%s1562_s7 + $0x200] sm:$0xff]  ;;  %v299_v61 = vld [vmem:[%s1552_s5 + $0x208] sm:$0xff] }
  0x77   : > { %2841 = vst [vmem:[#allocation22_spill] sm:$0xff] %v1908_v8 }
  0x78   : > { %928 = vst [vmem:[%s1573_s21 + $0x1b0] sm:$0xff] %v672_v26  ;;  %v678_v26 = vadd.f32 %v1908_v8, %v294_v2  ;;  %v1938_v2 = vld [vmem:[%s1562_s7 + $0x208] sm:$0xff]  ;;  %v300_v8 = vld [vmem:[%s1552_s5 + $0x210] sm:$0xff] }
  0x79   : > { %2842 = vst [vmem:[#allocation23_spill] sm:$0xff] %v1914_v20 }
  0x7a   : > { %929 = vst [vmem:[%s1573_s21 + $0x1b8] sm:$0xff] %v673_v39  ;;  %v679_v39 = vadd.f32 %v1914_v20, %v295_v11  ;;  %v1944_v11 = vld [vmem:[%s1562_s7 + $0x210] sm:$0xff]  ;;  %v301_v20 = vld [vmem:[%s1552_s5 + $0x218] sm:$0xff] }
  0x7b   : > { %2843 = vst [vmem:[#allocation24_spill] sm:$0xff] %v1920_v34 }
  0x7c   : > { %930 = vst [vmem:[%s1573_s21 + $0x1c0] sm:$0xff] %v674_v48  ;;  %v680_v48 = vadd.f32 %v1920_v34, %v296_v31  ;;  %v1950_v31 = vld [vmem:[%s1562_s7 + $0x218] sm:$0xff]  ;;  %v302_v34 = vld [vmem:[%s1552_s5 + $0x220] sm:$0xff] }
  0x7d   : > { %2844 = vst [vmem:[#allocation25_spill] sm:$0xff] %v1926_v45 }
  0x7e   : > { %931 = vst [vmem:[%s1573_s21 + $0x1c8] sm:$0xff] %v675_v58  ;;  %v681_v58 = vadd.f32 %v1926_v45, %v297_v40  ;;  %v1956_v40 = vld [vmem:[%s1562_s7 + $0x220] sm:$0xff]  ;;  %v303_v45 = vld [vmem:[%s1552_s5 + $0x228] sm:$0xff] }
  0x7f   : > { %2845 = vst [vmem:[#allocation26_spill] sm:$0xff] %v1932_v54 }
  0x80   : > { %932 = vst [vmem:[%s1573_s21 + $0x1d0] sm:$0xff] %v676_v3  ;;  %v682_v3 = vadd.f32 %v1932_v54, %v298_v52  ;;  %v1962_v52 = vld [vmem:[%s1562_s7 + $0x228] sm:$0xff]  ;;  %v304_v54 = vld [vmem:[%s1552_s5 + $0x230] sm:$0xff] }
  0x81   : > { %2846 = vst [vmem:[#allocation27_spill] sm:$0xff] %v1938_v2 }
  0x82   : > { %933 = vst [vmem:[%s1573_s21 + $0x1d8] sm:$0xff] %v677_v17  ;;  %v683_v17 = vadd.f32 %v1938_v2, %v299_v61  ;;  %v1968_v61 = vld [vmem:[%s1562_s7 + $0x230] sm:$0xff]  ;;  %v305_v2 = vld [vmem:[%s1552_s5 + $0x238] sm:$0xff] }
  0x83   : > { %2847 = vst [vmem:[#allocation28_spill] sm:$0xff] %v1944_v11 }
  0x84   : > { %934 = vst [vmem:[%s1573_s21 + $0x1e0] sm:$0xff] %v678_v26  ;;  %v684_v26 = vadd.f32 %v1944_v11, %v300_v8  ;;  %v1974_v8 = vld [vmem:[%s1562_s7 + $0x238] sm:$0xff]  ;;  %v306_v11 = vld [vmem:[%s1552_s5 + $0x240] sm:$0xff] }
  0x85   : > { %2848 = vst [vmem:[#allocation29_spill] sm:$0xff] %v1950_v31 }
  0x86   : > { %935 = vst [vmem:[%s1573_s21 + $0x1e8] sm:$0xff] %v679_v39  ;;  %v685_v39 = vadd.f32 %v1950_v31, %v301_v20  ;;  %v1980_v20 = vld [vmem:[%s1562_s7 + $0x240] sm:$0xff]  ;;  %v307_v31 = vld [vmem:[%s1552_s5 + $0x248] sm:$0xff] }
  0x87   : > { %2849 = vst [vmem:[#allocation30_spill] sm:$0xff] %v1956_v40 }
  0x88   : > { %936 = vst [vmem:[%s1573_s21 + $0x1f0] sm:$0xff] %v680_v48  ;;  %v686_v48 = vadd.f32 %v1956_v40, %v302_v34  ;;  %v1986_v34 = vld [vmem:[%s1562_s7 + $0x248] sm:$0xff]  ;;  %v308_v40 = vld [vmem:[%s1552_s5 + $0x250] sm:$0xff] }
  0x89   : > { %2850 = vst [vmem:[#allocation31_spill] sm:$0xff] %v1962_v52 }
  0x8a   : > { %937 = vst [vmem:[%s1573_s21 + $0x1f8] sm:$0xff] %v681_v58  ;;  %v687_v58 = vadd.f32 %v1962_v52, %v303_v45  ;;  %v1992_v45 = vld [vmem:[%s1562_s7 + $0x250] sm:$0xff]  ;;  %v309_v52 = vld [vmem:[%s1552_s5 + $0x258] sm:$0xff] }
  0x8b   : > { %2851 = vst [vmem:[#allocation32_spill] sm:$0xff] %v1968_v61 }
  0x8c   : > { %938 = vst [vmem:[%s1573_s21 + $0x200] sm:$0xff] %v682_v3  ;;  %v688_v3 = vadd.f32 %v1968_v61, %v304_v54  ;;  %v1998_v54 = vld [vmem:[%s1562_s7 + $0x258] sm:$0xff]  ;;  %v310_v61 = vld [vmem:[%s1552_s5 + $0x260] sm:$0xff] }
  0x8d   : > { %2852 = vst [vmem:[#allocation33_spill] sm:$0xff] %v1974_v8 }
  0x8e   : > { %939 = vst [vmem:[%s1573_s21 + $0x208] sm:$0xff] %v683_v17  ;;  %v689_v17 = vadd.f32 %v1974_v8, %v305_v2  ;;  %v2004_v2 = vld [vmem:[%s1562_s7 + $0x260] sm:$0xff]  ;;  %v311_v8 = vld [vmem:[%s1552_s5 + $0x268] sm:$0xff] }
  0x8f   : > { %2853 = vst [vmem:[#allocation34_spill] sm:$0xff] %v1980_v20 }
  0x90   : > { %940 = vst [vmem:[%s1573_s21 + $0x210] sm:$0xff] %v684_v26  ;;  %v690_v26 = vadd.f32 %v1980_v20, %v306_v11  ;;  %v2010_v11 = vld [vmem:[%s1562_s7 + $0x268] sm:$0xff]  ;;  %v312_v20 = vld [vmem:[%s1552_s5 + $0x270] sm:$0xff] }
  0x91   : > { %2854 = vst [vmem:[#allocation35_spill] sm:$0xff] %v1986_v34 }
  0x92   : > { %941 = vst [vmem:[%s1573_s21 + $0x218] sm:$0xff] %v685_v39  ;;  %v691_v39 = vadd.f32 %v1986_v34, %v307_v31  ;;  %v2016_v31 = vld [vmem:[%s1562_s7 + $0x270] sm:$0xff]  ;;  %v313_v34 = vld [vmem:[%s1552_s5 + $0x278] sm:$0xff] }
  0x93   : > { %2855 = vst [vmem:[#allocation36_spill] sm:$0xff] %v1992_v45 }
  0x94   : > { %942 = vst [vmem:[%s1573_s21 + $0x220] sm:$0xff] %v686_v48  ;;  %v692_v48 = vadd.f32 %v1992_v45, %v308_v40  ;;  %v2022_v40 = vld [vmem:[%s1562_s7 + $0x278] sm:$0xff]  ;;  %v314_v45 = vld [vmem:[%s1552_s5 + $0x280] sm:$0xff] }
  0x95   : > { %2856 = vst [vmem:[#allocation37_spill] sm:$0xff] %v1998_v54 }
  0x96   : > { %943 = vst [vmem:[%s1573_s21 + $0x228] sm:$0xff] %v687_v58  ;;  %v693_v58 = vadd.f32 %v1998_v54, %v309_v52  ;;  %v2028_v52 = vld [vmem:[%s1562_s7 + $0x280] sm:$0xff]  ;;  %v315_v54 = vld [vmem:[%s1552_s5 + $0x288] sm:$0xff] }
  0x97   : > { %2857 = vst [vmem:[#allocation38_spill] sm:$0xff] %v2004_v2 }
  0x98   : > { %944 = vst [vmem:[%s1573_s21 + $0x230] sm:$0xff] %v688_v3  ;;  %v694_v3 = vadd.f32 %v2004_v2, %v310_v61  ;;  %v2034_v61 = vld [vmem:[%s1562_s7 + $0x288] sm:$0xff]  ;;  %v316_v2 = vld [vmem:[%s1552_s5 + $0x290] sm:$0xff] }
  0x99   : > { %2858 = vst [vmem:[#allocation39_spill] sm:$0xff] %v2010_v11 }
  0x9a   : > { %945 = vst [vmem:[%s1573_s21 + $0x238] sm:$0xff] %v689_v17  ;;  %v695_v17 = vadd.f32 %v2010_v11, %v311_v8  ;;  %v2040_v8 = vld [vmem:[%s1562_s7 + $0x290] sm:$0xff]  ;;  %v317_v11 = vld [vmem:[%s1552_s5 + $0x298] sm:$0xff] }
  0x9b   : > { %2859 = vst [vmem:[#allocation40_spill] sm:$0xff] %v2016_v31 }
  0x9c   : > { %946 = vst [vmem:[%s1573_s21 + $0x240] sm:$0xff] %v690_v26  ;;  %v696_v26 = vadd.f32 %v2016_v31, %v312_v20  ;;  %v2046_v20 = vld [vmem:[%s1562_s7 + $0x298] sm:$0xff]  ;;  %v318_v31 = vld [vmem:[%s1552_s5 + $0x2a0] sm:$0xff] }
  0x9d   : > { %2860 = vst [vmem:[#allocation41_spill] sm:$0xff] %v2022_v40 }
  0x9e   : > { %947 = vst [vmem:[%s1573_s21 + $0x248] sm:$0xff] %v691_v39  ;;  %v697_v39 = vadd.f32 %v2022_v40, %v313_v34  ;;  %v2052_v34 = vld [vmem:[%s1562_s7 + $0x2a0] sm:$0xff]  ;;  %v319_v40 = vld [vmem:[%s1552_s5 + $0x2a8] sm:$0xff] }
  0x9f   : > { %2861 = vst [vmem:[#allocation42_spill] sm:$0xff] %v2028_v52 }
  0xa0   : > { %948 = vst [vmem:[%s1573_s21 + $0x250] sm:$0xff] %v692_v48  ;;  %v698_v48 = vadd.f32 %v2028_v52, %v314_v45  ;;  %v2058_v45 = vld [vmem:[%s1562_s7 + $0x2a8] sm:$0xff]  ;;  %v320_v52 = vld [vmem:[%s1552_s5 + $0x2b0] sm:$0xff] }
  0xa1   : > { %2862 = vst [vmem:[#allocation43_spill] sm:$0xff] %v2034_v61 }
  0xa2   : > { %949 = vst [vmem:[%s1573_s21 + $0x258] sm:$0xff] %v693_v58  ;;  %v699_v58 = vadd.f32 %v2034_v61, %v315_v54  ;;  %v2064_v54 = vld [vmem:[%s1562_s7 + $0x2b0] sm:$0xff]  ;;  %v321_v61 = vld [vmem:[%s1552_s5 + $0x2b8] sm:$0xff] }
  0xa3   : > { %2863 = vst [vmem:[#allocation44_spill] sm:$0xff] %v2040_v8 }
  0xa4   : > { %950 = vst [vmem:[%s1573_s21 + $0x260] sm:$0xff] %v694_v3  ;;  %v700_v3 = vadd.f32 %v2040_v8, %v316_v2  ;;  %v2070_v2 = vld [vmem:[%s1562_s7 + $0x2b8] sm:$0xff]  ;;  %v322_v8 = vld [vmem:[%s1552_s5 + $0x2c0] sm:$0xff] }
  0xa5   : > { %2864 = vst [vmem:[#allocation45_spill] sm:$0xff] %v2046_v20 }
  0xa6   : > { %951 = vst [vmem:[%s1573_s21 + $0x268] sm:$0xff] %v695_v17  ;;  %v701_v17 = vadd.f32 %v2046_v20, %v317_v11  ;;  %v2076_v11 = vld [vmem:[%s1562_s7 + $0x2c0] sm:$0xff]  ;;  %v323_v20 = vld [vmem:[%s1552_s5 + $0x2c8] sm:$0xff] }
  0xa7   : > { %2865 = vst [vmem:[#allocation46_spill] sm:$0xff] %v2052_v34 }
  0xa8   : > { %952 = vst [vmem:[%s1573_s21 + $0x270] sm:$0xff] %v696_v26  ;;  %v702_v26 = vadd.f32 %v2052_v34, %v318_v31  ;;  %v2082_v31 = vld [vmem:[%s1562_s7 + $0x2c8] sm:$0xff]  ;;  %v324_v34 = vld [vmem:[%s1552_s5 + $0x2d0] sm:$0xff] }
  0xa9   : > { %2866 = vst [vmem:[#allocation47_spill] sm:$0xff] %v2058_v45 }
  0xaa   : > { %953 = vst [vmem:[%s1573_s21 + $0x278] sm:$0xff] %v697_v39  ;;  %v703_v39 = vadd.f32 %v2058_v45, %v319_v40  ;;  %v2088_v40 = vld [vmem:[%s1562_s7 + $0x2d0] sm:$0xff]  ;;  %v325_v45 = vld [vmem:[%s1552_s5 + $0x2d8] sm:$0xff] }
  0xab   : > { %2867 = vst [vmem:[#allocation48_spill] sm:$0xff] %v2064_v54 }
  0xac   : > { %954 = vst [vmem:[%s1573_s21 + $0x280] sm:$0xff] %v698_v48  ;;  %v704_v48 = vadd.f32 %v2064_v54, %v320_v52  ;;  %v2094_v52 = vld [vmem:[%s1562_s7 + $0x2d8] sm:$0xff]  ;;  %v326_v54 = vld [vmem:[%s1552_s5 + $0x2e0] sm:$0xff] }
  0xad   : > { %2868 = vst [vmem:[#allocation49_spill] sm:$0xff] %v2070_v2 }
  0xae   : > { %955 = vst [vmem:[%s1573_s21 + $0x288] sm:$0xff] %v699_v58  ;;  %v705_v58 = vadd.f32 %v2070_v2, %v321_v61  ;;  %v2100_v61 = vld [vmem:[%s1562_s7 + $0x2e0] sm:$0xff]  ;;  %v327_v2 = vld [vmem:[%s1552_s5 + $0x2e8] sm:$0xff] }
  0xaf   : > { %2869 = vst [vmem:[#allocation50_spill] sm:$0xff] %v2076_v11 }
  0xb0   : > { %956 = vst [vmem:[%s1573_s21 + $0x290] sm:$0xff] %v700_v3  ;;  %v706_v3 = vadd.f32 %v2076_v11, %v322_v8  ;;  %v2106_v8 = vld [vmem:[%s1562_s7 + $0x2e8] sm:$0xff]  ;;  %v328_v11 = vld [vmem:[%s1552_s5 + $0x2f0] sm:$0xff] }
  0xb1   : > { %2870 = vst [vmem:[#allocation51_spill] sm:$0xff] %v2082_v31 }
  0xb2   : > { %957 = vst [vmem:[%s1573_s21 + $0x298] sm:$0xff] %v701_v17  ;;  %v707_v17 = vadd.f32 %v2082_v31, %v323_v20  ;;  %v2112_v20 = vld [vmem:[%s1562_s7 + $0x2f0] sm:$0xff]  ;;  %v329_v31 = vld [vmem:[%s1552_s5 + $0x2f8] sm:$0xff] }
  0xb3   : > { %2871 = vst [vmem:[#allocation52_spill] sm:$0xff] %v2088_v40 }
  0xb4   : > { %958 = vst [vmem:[%s1573_s21 + $0x2a0] sm:$0xff] %v702_v26  ;;  %v708_v26 = vadd.f32 %v2088_v40, %v324_v34  ;;  %v2118_v34 = vld [vmem:[%s1562_s7 + $0x2f8] sm:$0xff]  ;;  %v330_v40 = vld [vmem:[%s1552_s5 + $0x300] sm:$0xff] }
  0xb5   : > { %2872 = vst [vmem:[#allocation53_spill] sm:$0xff] %v2094_v52 }
  0xb6   : > { %959 = vst [vmem:[%s1573_s21 + $0x2a8] sm:$0xff] %v703_v39  ;;  %v709_v39 = vadd.f32 %v2094_v52, %v325_v45  ;;  %v2124_v45 = vld [vmem:[%s1562_s7 + $0x300] sm:$0xff]  ;;  %v331_v52 = vld [vmem:[%s1552_s5 + $0x308] sm:$0xff] }
  0xb7   : > { %2873 = vst [vmem:[#allocation54_spill] sm:$0xff] %v2100_v61 }
  0xb8   : > { %960 = vst [vmem:[%s1573_s21 + $0x2b0] sm:$0xff] %v704_v48  ;;  %v710_v48 = vadd.f32 %v2100_v61, %v326_v54  ;;  %v2130_v54 = vld [vmem:[%s1562_s7 + $0x308] sm:$0xff]  ;;  %v332_v61 = vld [vmem:[%s1552_s5 + $0x310] sm:$0xff] }
  0xb9   : > { %2874 = vst [vmem:[#allocation55_spill] sm:$0xff] %v2106_v8 }
  0xba   : > { %961 = vst [vmem:[%s1573_s21 + $0x2b8] sm:$0xff] %v705_v58  ;;  %v711_v58 = vadd.f32 %v2106_v8, %v327_v2  ;;  %v2136_v2 = vld [vmem:[%s1562_s7 + $0x310] sm:$0xff]  ;;  %v333_v8 = vld [vmem:[%s1552_s5 + $0x318] sm:$0xff] }
  0xbb   : > { %2875 = vst [vmem:[#allocation56_spill] sm:$0xff] %v2112_v20 }
  0xbc   : > { %962 = vst [vmem:[%s1573_s21 + $0x2c0] sm:$0xff] %v706_v3  ;;  %v712_v3 = vadd.f32 %v2112_v20, %v328_v11  ;;  %v2142_v11 = vld [vmem:[%s1562_s7 + $0x318] sm:$0xff]  ;;  %v334_v20 = vld [vmem:[%s1552_s5 + $0x320] sm:$0xff] }
  0xbd   : > { %2876 = vst [vmem:[#allocation57_spill] sm:$0xff] %v2118_v34 }
  0xbe   : > { %963 = vst [vmem:[%s1573_s21 + $0x2c8] sm:$0xff] %v707_v17  ;;  %v713_v17 = vadd.f32 %v2118_v34, %v329_v31  ;;  %v2148_v31 = vld [vmem:[%s1562_s7 + $0x320] sm:$0xff]  ;;  %v335_v34 = vld [vmem:[%s1552_s5 + $0x328] sm:$0xff] }
  0xbf   : > { %2877 = vst [vmem:[#allocation58_spill] sm:$0xff] %v2124_v45 }
  0xc0   : > { %964 = vst [vmem:[%s1573_s21 + $0x2d0] sm:$0xff] %v708_v26  ;;  %v714_v26 = vadd.f32 %v2124_v45, %v330_v40  ;;  %v2154_v40 = vld [vmem:[%s1562_s7 + $0x328] sm:$0xff]  ;;  %v336_v45 = vld [vmem:[%s1552_s5 + $0x330] sm:$0xff] }
  0xc1   : > { %2878 = vst [vmem:[#allocation59_spill] sm:$0xff] %v2130_v54 }
  0xc2   : > { %965 = vst [vmem:[%s1573_s21 + $0x2d8] sm:$0xff] %v709_v39  ;;  %v715_v39 = vadd.f32 %v2130_v54, %v331_v52  ;;  %v2160_v52 = vld [vmem:[%s1562_s7 + $0x330] sm:$0xff]  ;;  %v337_v54 = vld [vmem:[%s1552_s5 + $0x338] sm:$0xff] }
  0xc3   : > { %2879 = vst [vmem:[#allocation60_spill] sm:$0xff] %v2136_v2 }
  0xc4   : > { %966 = vst [vmem:[%s1573_s21 + $0x2e0] sm:$0xff] %v710_v48  ;;  %v716_v48 = vadd.f32 %v2136_v2, %v332_v61  ;;  %v2166_v61 = vld [vmem:[%s1562_s7 + $0x338] sm:$0xff]  ;;  %v338_v2 = vld [vmem:[%s1552_s5 + $0x340] sm:$0xff] }
  0xc5   : > { %2880 = vst [vmem:[#allocation61_spill] sm:$0xff] %v2142_v11 }
  0xc6   : > { %967 = vst [vmem:[%s1573_s21 + $0x2e8] sm:$0xff] %v711_v58  ;;  %v717_v58 = vadd.f32 %v2142_v11, %v333_v8  ;;  %v2172_v8 = vld [vmem:[%s1562_s7 + $0x340] sm:$0xff]  ;;  %v339_v11 = vld [vmem:[%s1552_s5 + $0x348] sm:$0xff] }
  0xc7   : > { %2881 = vst [vmem:[#allocation62_spill] sm:$0xff] %v2148_v31 }
  0xc8   : > { %968 = vst [vmem:[%s1573_s21 + $0x2f0] sm:$0xff] %v712_v3  ;;  %v718_v3 = vadd.f32 %v2148_v31, %v334_v20  ;;  %v2178_v20 = vld [vmem:[%s1562_s7 + $0x348] sm:$0xff]  ;;  %v340_v31 = vld [vmem:[%s1552_s5 + $0x350] sm:$0xff] }
  0xc9   : > { %2882 = vst [vmem:[#allocation63_spill] sm:$0xff] %v2154_v40 }
  0xca   : > { %969 = vst [vmem:[%s1573_s21 + $0x2f8] sm:$0xff] %v713_v17  ;;  %v719_v17 = vadd.f32 %v2154_v40, %v335_v34  ;;  %v2184_v34 = vld [vmem:[%s1562_s7 + $0x350] sm:$0xff]  ;;  %v341_v40 = vld [vmem:[%s1552_s5 + $0x358] sm:$0xff] }
  0xcb   : > { %2883 = vst [vmem:[#allocation64_spill] sm:$0xff] %v2160_v52 }
  0xcc   : > { %970 = vst [vmem:[%s1573_s21 + $0x300] sm:$0xff] %v714_v26  ;;  %v720_v26 = vadd.f32 %v2160_v52, %v336_v45  ;;  %v2190_v45 = vld [vmem:[%s1562_s7 + $0x358] sm:$0xff]  ;;  %v342_v52 = vld [vmem:[%s1552_s5 + $0x360] sm:$0xff] }
  0xcd   : > { %2884 = vst [vmem:[#allocation65_spill] sm:$0xff] %v2166_v61 }
  0xce   : > { %971 = vst [vmem:[%s1573_s21 + $0x308] sm:$0xff] %v715_v39  ;;  %v721_v39 = vadd.f32 %v2166_v61, %v337_v54  ;;  %v2196_v54 = vld [vmem:[%s1562_s7 + $0x360] sm:$0xff]  ;;  %v343_v61 = vld [vmem:[%s1552_s5 + $0x368] sm:$0xff] }
  0xcf   : > { %2885 = vst [vmem:[#allocation66_spill] sm:$0xff] %v2172_v8 }
  0xd0   : > { %972 = vst [vmem:[%s1573_s21 + $0x310] sm:$0xff] %v716_v48  ;;  %v722_v48 = vadd.f32 %v2172_v8, %v338_v2  ;;  %v2202_v2 = vld [vmem:[%s1562_s7 + $0x368] sm:$0xff]  ;;  %v344_v8 = vld [vmem:[%s1552_s5 + $0x370] sm:$0xff] }
  0xd1   : > { %2886 = vst [vmem:[#allocation67_spill] sm:$0xff] %v2178_v20 }
  0xd2   : > { %973 = vst [vmem:[%s1573_s21 + $0x318] sm:$0xff] %v717_v58  ;;  %v723_v58 = vadd.f32 %v2178_v20, %v339_v11  ;;  %v2208_v11 = vld [vmem:[%s1562_s7 + $0x370] sm:$0xff]  ;;  %v345_v20 = vld [vmem:[%s1552_s5 + $0x378] sm:$0xff] }
  0xd3   : > { %2887 = vst [vmem:[#allocation68_spill] sm:$0xff] %v2184_v34 }
  0xd4   : > { %974 = vst [vmem:[%s1573_s21 + $0x320] sm:$0xff] %v718_v3  ;;  %v724_v3 = vadd.f32 %v2184_v34, %v340_v31  ;;  %v2214_v31 = vld [vmem:[%s1562_s7 + $0x378] sm:$0xff]  ;;  %v346_v34 = vld [vmem:[%s1552_s5 + $0x380] sm:$0xff] }
  0xd5   : > { %2888 = vst [vmem:[#allocation69_spill] sm:$0xff] %v2190_v45 }
  0xd6   : > { %975 = vst [vmem:[%s1573_s21 + $0x328] sm:$0xff] %v719_v17  ;;  %v725_v17 = vadd.f32 %v2190_v45, %v341_v40  ;;  %v2220_v40 = vld [vmem:[%s1562_s7 + $0x380] sm:$0xff]  ;;  %v347_v45 = vld [vmem:[%s1552_s5 + $0x388] sm:$0xff] }
  0xd7   : > { %2889 = vst [vmem:[#allocation70_spill] sm:$0xff] %v2196_v54 }
  0xd8   : > { %976 = vst [vmem:[%s1573_s21 + $0x330] sm:$0xff] %v720_v26  ;;  %v726_v26 = vadd.f32 %v2196_v54, %v342_v52  ;;  %v2226_v52 = vld [vmem:[%s1562_s7 + $0x388] sm:$0xff]  ;;  %v348_v54 = vld [vmem:[%s1552_s5 + $0x390] sm:$0xff] }
  0xd9   : > { %2890 = vst [vmem:[#allocation71_spill] sm:$0xff] %v2202_v2 }
  0xda   : > { %977 = vst [vmem:[%s1573_s21 + $0x338] sm:$0xff] %v721_v39  ;;  %v727_v39 = vadd.f32 %v2202_v2, %v343_v61  ;;  %v2232_v61 = vld [vmem:[%s1562_s7 + $0x390] sm:$0xff]  ;;  %v349_v2 = vld [vmem:[%s1552_s5 + $0x398] sm:$0xff] }
  0xdb   : > { %2891 = vst [vmem:[#allocation72_spill] sm:$0xff] %v2208_v11 }
  0xdc   : > { %978 = vst [vmem:[%s1573_s21 + $0x340] sm:$0xff] %v722_v48  ;;  %v728_v48 = vadd.f32 %v2208_v11, %v344_v8  ;;  %v2238_v8 = vld [vmem:[%s1562_s7 + $0x398] sm:$0xff]  ;;  %v350_v11 = vld [vmem:[%s1552_s5 + $0x3a0] sm:$0xff] }
  0xdd   : > { %2892 = vst [vmem:[#allocation73_spill] sm:$0xff] %v2214_v31 }
  0xde   : > { %979 = vst [vmem:[%s1573_s21 + $0x348] sm:$0xff] %v723_v58  ;;  %v729_v58 = vadd.f32 %v2214_v31, %v345_v20  ;;  %v2244_v20 = vld [vmem:[%s1562_s7 + $0x3a0] sm:$0xff]  ;;  %v351_v31 = vld [vmem:[%s1552_s5 + $0x3a8] sm:$0xff] }
  0xdf   : > { %2893 = vst [vmem:[#allocation74_spill] sm:$0xff] %v2220_v40 }
  0xe0   : > { %980 = vst [vmem:[%s1573_s21 + $0x350] sm:$0xff] %v724_v3  ;;  %v730_v3 = vadd.f32 %v2220_v40, %v346_v34  ;;  %v2250_v34 = vld [vmem:[%s1562_s7 + $0x3a8] sm:$0xff]  ;;  %v352_v40 = vld [vmem:[%s1552_s5 + $0x3b0] sm:$0xff] }
  0xe1   : > { %2894 = vst [vmem:[#allocation75_spill] sm:$0xff] %v2226_v52 }
  0xe2   : > { %981 = vst [vmem:[%s1573_s21 + $0x358] sm:$0xff] %v725_v17  ;;  %v731_v17 = vadd.f32 %v2226_v52, %v347_v45  ;;  %v2256_v45 = vld [vmem:[%s1562_s7 + $0x3b0] sm:$0xff]  ;;  %v353_v52 = vld [vmem:[%s1552_s5 + $0x3b8] sm:$0xff] }
  0xe3   : > { %2895 = vst [vmem:[#allocation76_spill] sm:$0xff] %v2232_v61 }
  0xe4   : > { %982 = vst [vmem:[%s1573_s21 + $0x360] sm:$0xff] %v726_v26  ;;  %v732_v26 = vadd.f32 %v2232_v61, %v348_v54  ;;  %v2262_v54 = vld [vmem:[%s1562_s7 + $0x3b8] sm:$0xff]  ;;  %v354_v61 = vld [vmem:[%s1552_s5 + $0x3c0] sm:$0xff] }
  0xe5   : > { %2896 = vst [vmem:[#allocation77_spill] sm:$0xff] %v2238_v8 }
  0xe6   : > { %983 = vst [vmem:[%s1573_s21 + $0x368] sm:$0xff] %v727_v39  ;;  %v733_v39 = vadd.f32 %v2238_v8, %v349_v2  ;;  %v2268_v2 = vld [vmem:[%s1562_s7 + $0x3c0] sm:$0xff]  ;;  %v355_v8 = vld [vmem:[%s1552_s5 + $0x3c8] sm:$0xff] }
  0xe7   : > { %2897 = vst [vmem:[#allocation78_spill] sm:$0xff] %v2244_v20 }
  0xe8   : > { %984 = vst [vmem:[%s1573_s21 + $0x370] sm:$0xff] %v728_v48  ;;  %v734_v48 = vadd.f32 %v2244_v20, %v350_v11  ;;  %v2274_v11 = vld [vmem:[%s1562_s7 + $0x3c8] sm:$0xff]  ;;  %v356_v20 = vld [vmem:[%s1552_s5 + $0x3d0] sm:$0xff] }
  0xe9   : > { %2898 = vst [vmem:[#allocation79_spill] sm:$0xff] %v2250_v34 }
  0xea   : > { %985 = vst [vmem:[%s1573_s21 + $0x378] sm:$0xff] %v729_v58  ;;  %v735_v58 = vadd.f32 %v2250_v34, %v351_v31  ;;  %v2280_v31 = vld [vmem:[%s1562_s7 + $0x3d0] sm:$0xff]  ;;  %v357_v34 = vld [vmem:[%s1552_s5 + $0x3d8] sm:$0xff] }
  0xeb   : > { %2899 = vst [vmem:[#allocation80_spill] sm:$0xff] %v2256_v45 }
  0xec   : > { %986 = vst [vmem:[%s1573_s21 + $0x380] sm:$0xff] %v730_v3  ;;  %v736_v3 = vadd.f32 %v2256_v45, %v352_v40  ;;  %v2286_v40 = vld [vmem:[%s1562_s7 + $0x3d8] sm:$0xff]  ;;  %v358_v45 = vld [vmem:[%s1552_s5 + $0x3e0] sm:$0xff] }
  0xed   : > { %2900 = vst [vmem:[#allocation81_spill] sm:$0xff] %v2262_v54 }
  0xee   : > { %987 = vst [vmem:[%s1573_s21 + $0x388] sm:$0xff] %v731_v17  ;;  %v737_v17 = vadd.f32 %v2262_v54, %v353_v52  ;;  %v2292_v52 = vld [vmem:[%s1562_s7 + $0x3e0] sm:$0xff]  ;;  %v359_v54 = vld [vmem:[%s1552_s5 + $0x3e8] sm:$0xff] }
  0xef   : > { %2901 = vst [vmem:[#allocation82_spill] sm:$0xff] %v2268_v2 }
  0xf0   : > { %988 = vst [vmem:[%s1573_s21 + $0x390] sm:$0xff] %v732_v26  ;;  %v738_v26 = vadd.f32 %v2268_v2, %v354_v61  ;;  %v2298_v61 = vld [vmem:[%s1562_s7 + $0x3e8] sm:$0xff]  ;;  %v360_v2 = vld [vmem:[%s1552_s5 + $0x3f0] sm:$0xff] }
  0xf1   : > { %2902 = vst [vmem:[#allocation83_spill] sm:$0xff] %v2274_v11 }
  0xf2   : > { %989 = vst [vmem:[%s1573_s21 + $0x398] sm:$0xff] %v733_v39  ;;  %v739_v39 = vadd.f32 %v2274_v11, %v355_v8  ;;  %v2304_v8 = vld [vmem:[%s1562_s7 + $0x3f0] sm:$0xff] }
  0xf3   : > { %2903 = vst [vmem:[#allocation84_spill] sm:$0xff] %v2280_v31 }
  0xf4   : > { %990 = vst [vmem:[%s1573_s21 + $0x3a0] sm:$0xff] %v734_v48  ;;  %v740_v48 = vadd.f32 %v2280_v31, %v356_v20  ;;  %v361_v20 = vld [vmem:[%s1552_s5 + $0x3f8] sm:$0xff] }
  0xf5   : > { %2904 = vst [vmem:[#allocation85_spill] sm:$0xff] %v2286_v40  ;;  %v2310_v31 = vld [vmem:[%s1562_s7 + $0x3f8] sm:$0xff] }
  0xf6   : > { %991 = vst [vmem:[%s1573_s21 + $0x3a8] sm:$0xff] %v735_v58  ;;  %v741_v58 = vadd.f32 %v2286_v40, %v357_v34  ;;  %v362_v34 = vld [vmem:[%s1552_s5 + $0x400] sm:$0xff]  ;;  %v744_v40 = vadd.f32 %v2304_v8, %v360_v2 }
  0xf7   : > { %2905 = vst [vmem:[#allocation86_spill] sm:$0xff] %v2292_v52 }
  0xf8   : > { %992 = vst [vmem:[%s1573_s21 + $0x3b0] sm:$0xff] %v736_v3  ;;  %v742_v3 = vadd.f32 %v2292_v52, %v358_v45  ;;  %v745_v45 = vadd.f32 %v2310_v31, %v361_v20  ;;  %v364_v52 = vld [vmem:[%s1552_s5 + $0x410] sm:$0xff] }
  0xf9   : > { %993 = vst [vmem:[%s1573_s21 + $0x3b8] sm:$0xff] %v737_v17  ;;  %v743_v17 = vadd.f32 %v2298_v61, %v359_v54  ;;  %v365_v54 = vld [vmem:[%s1552_s5 + $0x418] sm:$0xff] }
  0xfa   : > { %2906 = vst [vmem:[#allocation87_spill] sm:$0xff] %v2304_v8  ;;  %v366_v8 = vld [vmem:[%s1552_s5 + $0x420] sm:$0xff] }
  0xfb   : > { %994 = vst [vmem:[%s1573_s21 + $0x3c0] sm:$0xff] %v738_v26  ;;  %v363_v26 = vld [vmem:[%s1552_s5 + $0x408] sm:$0xff] }
  0xfc   : > { %2907 = vst [vmem:[#allocation88_spill] sm:$0xff] %v2310_v31  ;;  %v367_v31 = vld [vmem:[%s1552_s5 + $0x428] sm:$0xff] }
  0xfd   : > { %995 = vst [vmem:[%s1573_s21 + $0x3c8] sm:$0xff] %v739_v39  ;;  %v1373_v39 = vld [vmem:[%s1562_s7] sm:$0xff] }
  0xfe   : > { %996 = vst [vmem:[%s1573_s21 + $0x3d0] sm:$0xff] %v740_v48  ;;  %v746_v11 = vadd.f32 %v1373_v39, %v362_v34  ;;  %v1374_v48 = vld [vmem:[%s1562_s7 + $0x8] sm:$0xff]  ;;  %v368_v39 = vld [vmem:[%s1552_s5 + $0x430] sm:$0xff] }
  0xff   : > { %997 = vst [vmem:[%s1573_s21 + $0x3d8] sm:$0xff] %v741_v58  ;;  %v747_v2 = vadd.f32 %v1374_v48, %v363_v26  ;;  %v1375_v58 = vld [vmem:[%s1562_s7 + $0x10] sm:$0xff]  ;;  %v369_v26 = vld [vmem:[%s1552_s5 + $0x438] sm:$0xff] }
 0x100   : > { %998 = vst [vmem:[%s1573_s21 + $0x3e0] sm:$0xff] %v742_v3  ;;  %v748_v20 = vadd.f32 %v1375_v58, %v364_v52  ;;  %v1376_v3 = vld [vmem:[%s1562_s7 + $0x18] sm:$0xff]  ;;  %v370_v52 = vld [vmem:[%s1552_s5 + $0x440] sm:$0xff] }
 0x101   : > { %999 = vst [vmem:[%s1573_s21 + $0x3e8] sm:$0xff] %v743_v17  ;;  %v749_v34 = vadd.f32 %v1376_v3, %v365_v54  ;;  %v750_v17 = vadd.f32 %v1577_v13, %v366_v8  ;;  %v371_v54 = vld [vmem:[%s1552_s5 + $0x448] sm:$0xff]  ;;  %v372_v13 = vld [vmem:[%s1552_s5 + $0x450] sm:$0xff]  ;;  %v754_v8 = vadd.f32 %v1598_v24, %v370_v52 }
 0x102   : > { %1000 = vst [vmem:[%s1573_s21 + $0x3f0] sm:$0xff] %v744_v40  ;;  %v751_v40 = vadd.f32 %v1581_v15, %v367_v31  ;;  %v373_v15 = vld [vmem:[%s1552_s5 + $0x458] sm:$0xff]  ;;  %v755_v31 = vadd.f32 %v1604_v27, %v371_v54  ;;  %v756_v48 = vadd.f32 %v1610_v30, %v372_v13  ;;  %v376_v24 = vld [vmem:[%s1552_s5 + $0x470] sm:$0xff]  ;;  %v378_v30 = vld [vmem:[%s1552_s5 + $0x480] sm:$0xff] }
 0x103   : > { %1001 = vst [vmem:[%s1573_s21 + $0x3f8] sm:$0xff] %v745_v45  ;;  %v752_v45 = vadd.f32 %v1588_v19, %v368_v39  ;;  %v374_v19 = vld [vmem:[%s1552_s5 + $0x460] sm:$0xff]  ;;  %v377_v27 = vld [vmem:[%s1552_s5 + $0x478] sm:$0xff]  ;;  %v760_v3 = vadd.f32 %v1632_v41, %v376_v24  ;;  %v762_v39 = vadd.f32 %v1644_v47, %v378_v30  ;;  %v384_v47 = vld [vmem:[%s1552_s5 + $0x4b0] sm:$0xff] }
 0x104   : > { %1002 = vst [vmem:[%s1573_s21 + $0x400] sm:$0xff] %v746_v11  ;;  %v753_v11 = vadd.f32 %v1594_v22, %v369_v26  ;;  %v375_v22 = vld [vmem:[%s1552_s5 + $0x468] sm:$0xff]  ;;  %v758_v58 = vadd.f32 %v1620_v35, %v374_v19  ;;  %v380_v35 = vld [vmem:[%s1552_s5 + $0x490] sm:$0xff]  ;;  %v382_v41 = vld [vmem:[%s1552_s5 + $0x4a0] sm:$0xff]  ;;  %v768_v54 = vadd.f32 %v1680_v1, %v384_v47 }
 0x105   : > { %1003 = vst [vmem:[%s1573_s21 + $0x408] sm:$0xff] %v747_v2  ;;  %v757_v2 = vadd.f32 %v1614_v32, %v373_v15  ;;  %v379_v32 = vld [vmem:[%s1552_s5 + $0x488] sm:$0xff]  ;;  %v764_v26 = vadd.f32 %v1656_v53, %v380_v35  ;;  %v766_v52 = vadd.f32 %v1668_v59, %v382_v41  ;;  %v386_v53 = vld [vmem:[%s1552_s5 + $0x4c0] sm:$0xff]  ;;  %v388_v59 = vld [vmem:[%s1552_s5 + $0x4d0] sm:$0xff] }
 0x106   : > { %1004 = vst [vmem:[%s1573_s21 + $0x410] sm:$0xff] %v748_v20  ;;  %v759_v20 = vadd.f32 %v1626_v38, %v375_v22  ;;  %v381_v38 = vld [vmem:[%s1552_s5 + $0x498] sm:$0xff]  ;;  %v770_v13 = vadd.f32 %v1692_v7, %v386_v53  ;;  %v390_v1 = vld [vmem:[%s1552_s5 + $0x4e0] sm:$0xff]  ;;  %v772_v15 = vadd.f32 %v1704_v14, %v388_v59  ;;  %v392_v7 = vld [vmem:[%s1552_s5 + $0x4f0] sm:$0xff] }
 0x107   : > { %1005 = vst [vmem:[%s1573_s21 + $0x418] sm:$0xff] %v749_v34  ;;  %v761_v34 = vadd.f32 %v1638_v44, %v377_v27  ;;  %v383_v44 = vld [vmem:[%s1552_s5 + $0x4a8] sm:$0xff]  ;;  %v774_v19 = vadd.f32 %v1716_v23, %v390_v1  ;;  %v394_v14 = vld [vmem:[%s1552_s5 + $0x500] sm:$0xff]  ;;  %v776_v22 = vadd.f32 %v1728_v33, %v392_v7  ;;  %v396_v23 = vld [vmem:[%s1552_s5 + $0x510] sm:$0xff] }
 0x108   : > { %1006 = vst [vmem:[%s1573_s21 + $0x420] sm:$0xff] %v750_v17  ;;  %v763_v17 = vadd.f32 %v1650_v50, %v379_v32  ;;  %v385_v50 = vld [vmem:[%s1552_s5 + $0x4b8] sm:$0xff]  ;;  %v778_v24 = vadd.f32 %v1740_v42, %v394_v14  ;;  %v398_v33 = vld [vmem:[%s1552_s5 + $0x520] sm:$0xff]  ;;  %v780_v27 = vadd.f32 %v1752_v51, %v396_v23  ;;  %v400_v42 = vld [vmem:[%s1552_s5 + $0x530] sm:$0xff] }
 0x109   : > { %1007 = vst [vmem:[%s1573_s21 + $0x428] sm:$0xff] %v751_v40  ;;  %v765_v40 = vadd.f32 %v1662_v56, %v381_v38  ;;  %v387_v56 = vld [vmem:[%s1552_s5 + $0x4c8] sm:$0xff]  ;;  %v782_v30 = vadd.f32 %v1764_v60, %v398_v33  ;;  %v402_v51 = vld [vmem:[%s1552_s5 + $0x540] sm:$0xff]  ;;  %v784_v32 = vadd.f32 %v1776_v5, %v400_v42  ;;  %v404_v60 = vld [vmem:[%s1552_s5 + $0x550] sm:$0xff] }
 0x10a   : > { %1008 = vst [vmem:[%s1573_s21 + $0x430] sm:$0xff] %v752_v45  ;;  %v767_v45 = vadd.f32 %v1674_v62, %v383_v44  ;;  %v389_v62 = vld [vmem:[%s1552_s5 + $0x4d8] sm:$0xff]  ;;  %v786_v35 = vadd.f32 %v1788_v16, %v402_v51  ;;  %v406_v5 = vld [vmem:[%s1552_s5 + $0x560] sm:$0xff]  ;;  %v788_v38 = vadd.f32 %v1800_v29, %v404_v60  ;;  %v408_v16 = vld [vmem:[%s1552_s5 + $0x570] sm:$0xff] }
 0x10b   : > { %1009 = vst [vmem:[%s1573_s21 + $0x438] sm:$0xff] %v753_v11  ;;  %v769_v11 = vadd.f32 %v1686_v4, %v385_v50  ;;  %v391_v4 = vld [vmem:[%s1552_s5 + $0x4e8] sm:$0xff]  ;;  %v790_v41 = vadd.f32 %v1812_v43, %v406_v5  ;;  %v410_v29 = vld [vmem:[%s1552_s5 + $0x580] sm:$0xff]  ;;  %v792_v44 = vadd.f32 %v1824_v57, %v408_v16  ;;  %v412_v43 = vld [vmem:[%s1552_s5 + $0x590] sm:$0xff] }
 0x10c   : > { %1010 = vst [vmem:[%s1573_s21 + $0x440] sm:$0xff] %v754_v8  ;;  %v771_v8 = vadd.f32 %v1698_v10, %v387_v56  ;;  %v393_v10 = vld [vmem:[%s1552_s5 + $0x4f8] sm:$0xff]  ;;  %v794_v47 = vadd.f32 %v1836_v6, %v410_v29  ;;  %v414_v57 = vld [vmem:[%s1552_s5 + $0x5a0] sm:$0xff]  ;;  %v796_v50 = vadd.f32 %v1848_v25, %v412_v43  ;;  %v416_v6 = vld [vmem:[%s1552_s5 + $0x5b0] sm:$0xff] }
 0x10d   : > { %1011 = vst [vmem:[%s1573_s21 + $0x448] sm:$0xff] %v755_v31  ;;  %v773_v31 = vadd.f32 %v1710_v18, %v389_v62  ;;  %v395_v18 = vld [vmem:[%s1552_s5 + $0x508] sm:$0xff]  ;;  %v418_v25 = vld [vmem:[%s1552_s5 + $0x5c0] sm:$0xff] }
 0x10e   : > { %1012 = vst [vmem:[%s1573_s21 + $0x450] sm:$0xff] %v756_v48  ;;  %v775_v48 = vadd.f32 %v1722_v28, %v391_v4  ;;  %v397_v28 = vld [vmem:[%s1552_s5 + $0x518] sm:$0xff]  ;;  %v2912_v1 = vld [vmem:[#allocation17_spill] sm:$0xff]  ;;  %v420_v4 = vld [vmem:[%s1552_s5 + $0x5d0] sm:$0xff] }
 0x10f   : > { %1013 = vst [vmem:[%s1573_s21 + $0x458] sm:$0xff] %v757_v2  ;;  %v777_v2 = vadd.f32 %v1734_v37, %v393_v10  ;;  %v399_v37 = vld [vmem:[%s1552_s5 + $0x528] sm:$0xff]  ;;  %v2914_v10 = vld [vmem:[#allocation19_spill] sm:$0xff]  ;;  %v422_v14 = vld [vmem:[%s1552_s5 + $0x5e0] sm:$0xff] }
 0x110   : > { %1014 = vst [vmem:[%s1573_s21 + $0x460] sm:$0xff] %v758_v58  ;;  %v779_v58 = vadd.f32 %v1746_v46, %v395_v18  ;;  %v401_v46 = vld [vmem:[%s1552_s5 + $0x538] sm:$0xff]  ;;  %v2916_v23 = vld [vmem:[#allocation21_spill] sm:$0xff] }
 0x111   : > { %1015 = vst [vmem:[%s1573_s21 + $0x468] sm:$0xff] %v759_v20  ;;  %v781_v20 = vadd.f32 %v1758_v55, %v397_v28  ;;  %v403_v55 = vld [vmem:[%s1552_s5 + $0x548] sm:$0xff]  ;;  %v424_v28 = vld [vmem:[%s1552_s5 + $0x5f0] sm:$0xff]  ;;  %v426_v42 = vld [vmem:[%s1552_s5 + $0x600] sm:$0xff] }
 0x112   : > { %1016 = vst [vmem:[%s1573_s21 + $0x470] sm:$0xff] %v760_v3  ;;  %v783_v3 = vadd.f32 %v1770_v0, %v399_v37  ;;  %v405_v0 = vld [vmem:[%s1552_s5 + $0x558] sm:$0xff]  ;;  %v2918_v37 = vld [vmem:[#allocation23_spill] sm:$0xff]  ;;  %v2920_v51 = vld [vmem:[#allocation25_spill] sm:$0xff] }
 0x113   : > { %1017 = vst [vmem:[%s1573_s21 + $0x478] sm:$0xff] %v761_v34  ;;  %v785_v34 = vadd.f32 %v1782_v9, %v401_v46  ;;  %v407_v9 = vld [vmem:[%s1552_s5 + $0x568] sm:$0xff]  ;;  %v430_v5 = vld [vmem:[%s1552_s5 + $0x620] sm:$0xff] }
 0x114   : > { %1018 = vst [vmem:[%s1573_s21 + $0x480] sm:$0xff] %v762_v39  ;;  %v787_v39 = vadd.f32 %v1794_v21, %v403_v55  ;;  %v409_v21 = vld [vmem:[%s1552_s5 + $0x578] sm:$0xff]  ;;  %v428_v55 = vld [vmem:[%s1552_s5 + $0x610] sm:$0xff]  ;;  %v2924_v16 = vld [vmem:[#allocation29_spill] sm:$0xff] }
 0x115   : > { %1019 = vst [vmem:[%s1573_s21 + $0x488] sm:$0xff] %v763_v17  ;;  %v789_v17 = vadd.f32 %v1806_v36, %v405_v0  ;;  %v411_v36 = vld [vmem:[%s1552_s5 + $0x588] sm:$0xff]  ;;  %v2922_v0 = vld [vmem:[#allocation27_spill] sm:$0xff]  ;;  %v434_v43 = vld [vmem:[%s1552_s5 + $0x640] sm:$0xff] }
 0x116   : > { %1020 = vst [vmem:[%s1573_s21 + $0x490] sm:$0xff] %v764_v26  ;;  %v791_v26 = vadd.f32 %v1818_v49, %v407_v9  ;;  %v413_v49 = vld [vmem:[%s1552_s5 + $0x598] sm:$0xff] }
 0x117   : > { %1021 = vst [vmem:[%s1573_s21 + $0x498] sm:$0xff] %v765_v40  ;;  %v793_v40 = vadd.f32 %v1830_v63, %v409_v21  ;;  %v415_v63 = vld [vmem:[%s1552_s5 + $0x5a8] sm:$0xff]  ;;  %v432_v21 = vld [vmem:[%s1552_s5 + $0x630] sm:$0xff] }
 0x118   : > { %1022 = vst [vmem:[%s1573_s21 + $0x4a0] sm:$0xff] %v766_v52  ;;  %v795_v52 = vadd.f32 %v1842_v12, %v411_v36  ;;  %v417_v12 = vld [vmem:[%s1552_s5 + $0x5b8] sm:$0xff]  ;;  %v2926_v36 = vld [vmem:[#allocation31_spill] sm:$0xff] }
 0x119   : > { %1023 = vst [vmem:[%s1573_s21 + $0x4a8] sm:$0xff] %v767_v45  ;;  %v2908_v45 = vld [vmem:[#allocation13_spill] sm:$0xff] }
 0x11a   : > { %1024 = vst [vmem:[%s1573_s21 + $0x4b0] sm:$0xff] %v768_v54  ;;  %v797_v53 = vadd.f32 %v2908_v45, %v413_v49  ;;  %v2909_v54 = vld [vmem:[#allocation14_spill] sm:$0xff] }
 0x11b   : > { %1025 = vst [vmem:[%s1573_s21 + $0x4b8] sm:$0xff] %v769_v11  ;;  %v798_v56 = vadd.f32 %v2909_v54, %v414_v57  ;;  %v2910_v11 = vld [vmem:[#allocation15_spill] sm:$0xff]  ;;  %v2928_v57 = vld [vmem:[#allocation33_spill] sm:$0xff]  ;;  %v2929_v45 = vld [vmem:[#allocation34_spill] sm:$0xff] }
 0x11c   : > { %1026 = vst [vmem:[%s1573_s21 + $0x4c0] sm:$0xff] %v770_v13  ;;  %v799_v59 = vadd.f32 %v2910_v11, %v415_v63  ;;  %v2911_v13 = vld [vmem:[#allocation16_spill] sm:$0xff]  ;;  %v436_v63 = vld [vmem:[%s1552_s5 + $0x650] sm:$0xff] }
 0x11d   : > { %1027 = vst [vmem:[%s1573_s21 + $0x4c8] sm:$0xff] %v771_v8  ;;  %v800_v62 = vadd.f32 %v2911_v13, %v416_v6  ;;  %v419_v8 = vld [vmem:[%s1552_s5 + $0x5c8] sm:$0xff]  ;;  %v437_v6 = vld [vmem:[%s1552_s5 + $0x658] sm:$0xff]  ;;  %v2930_v54 = vld [vmem:[#allocation35_spill] sm:$0xff] }
 0x11e   : > { %1028 = vst [vmem:[%s1573_s21 + $0x4d0] sm:$0xff] %v772_v15  ;;  %v801_v15 = vadd.f32 %v2912_v1, %v417_v12  ;;  %v438_v12 = vld [vmem:[%s1552_s5 + $0x660] sm:$0xff]  ;;  %v2931_v11 = vld [vmem:[#allocation36_spill] sm:$0xff]  ;;  %v2933_v1 = vld [vmem:[#allocation38_spill] sm:$0xff] }
 0x11f   : > { %1029 = vst [vmem:[%s1573_s21 + $0x4d8] sm:$0xff] %v773_v31  ;;  %v2913_v31 = vld [vmem:[#allocation18_spill] sm:$0xff]  ;;  %v2932_v13 = vld [vmem:[#allocation37_spill] sm:$0xff] }
 0x120   : > { %1030 = vst [vmem:[%s1573_s21 + $0x4e0] sm:$0xff] %v774_v19  ;;  %v802_v7 = vadd.f32 %v2913_v31, %v418_v25  ;;  %v421_v19 = vld [vmem:[%s1552_s5 + $0x5d8] sm:$0xff]  ;;  %v439_v25 = vld [vmem:[%s1552_s5 + $0x668] sm:$0xff]  ;;  %v2934_v31 = vld [vmem:[#allocation39_spill] sm:$0xff] }
 0x121   : > { %1031 = vst [vmem:[%s1573_s21 + $0x4e8] sm:$0xff] %v775_v48  ;;  %v803_v48 = vadd.f32 %v2914_v10, %v419_v8  ;;  %v440_v8 = vld [vmem:[%s1552_s5 + $0x670] sm:$0xff]  ;;  %v2935_v10 = vld [vmem:[#allocation40_spill] sm:$0xff] }
 0x122   : > { %1032 = vst [vmem:[%s1573_s21 + $0x4f0] sm:$0xff] %v776_v22  ;;  %v2915_v22 = vld [vmem:[#allocation20_spill] sm:$0xff] }
 0x123   : > { %1033 = vst [vmem:[%s1573_s21 + $0x4f8] sm:$0xff] %v777_v2  ;;  %v804_v18 = vadd.f32 %v2915_v22, %v420_v4  ;;  %v423_v2 = vld [vmem:[%s1552_s5 + $0x5e8] sm:$0xff]  ;;  %v441_v4 = vld [vmem:[%s1552_s5 + $0x678] sm:$0xff]  ;;  %v2936_v22 = vld [vmem:[#allocation41_spill] sm:$0xff] }
 0x124   : > { %1034 = vst [vmem:[%s1573_s21 + $0x500] sm:$0xff] %v778_v24  ;;  %v805_v24 = vadd.f32 %v2916_v23, %v421_v19  ;;  %v442_v19 = vld [vmem:[%s1552_s5 + $0x680] sm:$0xff]  ;;  %v2937_v23 = vld [vmem:[#allocation42_spill] sm:$0xff] }
 0x125   : > { %1035 = vst [vmem:[%s1573_s21 + $0x508] sm:$0xff] %v779_v58  ;;  %v2917_v58 = vld [vmem:[#allocation22_spill] sm:$0xff] }
 0x126   : > { %1036 = vst [vmem:[%s1573_s21 + $0x510] sm:$0xff] %v780_v27  ;;  %v806_v33 = vadd.f32 %v2917_v58, %v422_v14  ;;  %v425_v27 = vld [vmem:[%s1552_s5 + $0x5f8] sm:$0xff]  ;;  %v443_v14 = vld [vmem:[%s1552_s5 + $0x688] sm:$0xff]  ;;  %v2938_v58 = vld [vmem:[#allocation43_spill] sm:$0xff] }
 0x127   : > { %1037 = vst [vmem:[%s1573_s21 + $0x518] sm:$0xff] %v781_v20  ;;  %v807_v20 = vadd.f32 %v2918_v37, %v423_v2  ;;  %v444_v2 = vld [vmem:[%s1552_s5 + $0x690] sm:$0xff]  ;;  %v2939_v37 = vld [vmem:[#allocation44_spill] sm:$0xff] }
 0x128   : > { %1038 = vst [vmem:[%s1573_s21 + $0x520] sm:$0xff] %v782_v30  ;;  %v2919_v30 = vld [vmem:[#allocation24_spill] sm:$0xff] }
 0x129   : > { %1039 = vst [vmem:[%s1573_s21 + $0x528] sm:$0xff] %v783_v3  ;;  %v808_v46 = vadd.f32 %v2919_v30, %v424_v28  ;;  %v427_v3 = vld [vmem:[%s1552_s5 + $0x608] sm:$0xff]  ;;  %v445_v28 = vld [vmem:[%s1552_s5 + $0x698] sm:$0xff]  ;;  %v2940_v30 = vld [vmem:[#allocation45_spill] sm:$0xff] }
 0x12a   : > { %1040 = vst [vmem:[%s1573_s21 + $0x530] sm:$0xff] %v784_v32  ;;  %v809_v32 = vadd.f32 %v2920_v51, %v425_v27  ;;  %v446_v27 = vld [vmem:[%s1552_s5 + $0x6a0] sm:$0xff]  ;;  %v2941_v51 = vld [vmem:[#allocation46_spill] sm:$0xff] }
 0x12b   : > { %1041 = vst [vmem:[%s1573_s21 + $0x538] sm:$0xff] %v785_v34  ;;  %v2921_v34 = vld [vmem:[#allocation26_spill] sm:$0xff] }
 0x12c   : > { %1042 = vst [vmem:[%s1573_s21 + $0x540] sm:$0xff] %v786_v35  ;;  %v810_v60 = vadd.f32 %v2921_v34, %v426_v42  ;;  %v429_v35 = vld [vmem:[%s1552_s5 + $0x618] sm:$0xff]  ;;  %v447_v42 = vld [vmem:[%s1552_s5 + $0x6a8] sm:$0xff]  ;;  %v2942_v34 = vld [vmem:[#allocation47_spill] sm:$0xff] }
 0x12d   : > { %1043 = vst [vmem:[%s1573_s21 + $0x548] sm:$0xff] %v787_v39  ;;  %v811_v39 = vadd.f32 %v2922_v0, %v427_v3  ;;  %v448_v3 = vld [vmem:[%s1552_s5 + $0x6b0] sm:$0xff]  ;;  %v2943_v0 = vld [vmem:[#allocation48_spill] sm:$0xff] }
 0x12e   : > { %1044 = vst [vmem:[%s1573_s21 + $0x550] sm:$0xff] %v788_v38  ;;  %v2923_v38 = vld [vmem:[#allocation28_spill] sm:$0xff] }
 0x12f   : > { %1045 = vst [vmem:[%s1573_s21 + $0x558] sm:$0xff] %v789_v17  ;;  %v812_v9 = vadd.f32 %v2923_v38, %v428_v55  ;;  %v431_v17 = vld [vmem:[%s1552_s5 + $0x628] sm:$0xff]  ;;  %v449_v55 = vld [vmem:[%s1552_s5 + $0x6b8] sm:$0xff]  ;;  %v2944_v38 = vld [vmem:[#allocation49_spill] sm:$0xff] }
 0x130   : > { %1046 = vst [vmem:[%s1573_s21 + $0x560] sm:$0xff] %v790_v41  ;;  %v813_v41 = vadd.f32 %v2924_v16, %v429_v35  ;;  %v450_v35 = vld [vmem:[%s1552_s5 + $0x6c0] sm:$0xff]  ;;  %v2945_v16 = vld [vmem:[#allocation50_spill] sm:$0xff] }
 0x131   : > { %1047 = vst [vmem:[%s1573_s21 + $0x568] sm:$0xff] %v791_v26  ;;  %v2925_v26 = vld [vmem:[#allocation30_spill] sm:$0xff] }
 0x132   : > { %1048 = vst [vmem:[%s1573_s21 + $0x570] sm:$0xff] %v792_v44  ;;  %v814_v29 = vadd.f32 %v2925_v26, %v430_v5  ;;  %v433_v44 = vld [vmem:[%s1552_s5 + $0x638] sm:$0xff]  ;;  %v451_v5 = vld [vmem:[%s1552_s5 + $0x6c8] sm:$0xff]  ;;  %v2946_v26 = vld [vmem:[#allocation51_spill] sm:$0xff] }
 0x133   : > { %1049 = vst [vmem:[%s1573_s21 + $0x578] sm:$0xff] %v793_v40  ;;  %v815_v40 = vadd.f32 %v2926_v36, %v431_v17  ;;  %v452_v17 = vld [vmem:[%s1552_s5 + $0x6d0] sm:$0xff]  ;;  %v2947_v36 = vld [vmem:[#allocation52_spill] sm:$0xff] }
 0x134   : > { %1050 = vst [vmem:[%s1573_s21 + $0x580] sm:$0xff] %v794_v47  ;;  %v2927_v47 = vld [vmem:[#allocation32_spill] sm:$0xff] }
 0x135   : > { %1051 = vst [vmem:[%s1573_s21 + $0x588] sm:$0xff] %v795_v52  ;;  %v816_v49 = vadd.f32 %v2927_v47, %v432_v21  ;;  %v435_v52 = vld [vmem:[%s1552_s5 + $0x648] sm:$0xff]  ;;  %v453_v21 = vld [vmem:[%s1552_s5 + $0x6d8] sm:$0xff]  ;;  %v2948_v47 = vld [vmem:[#allocation53_spill] sm:$0xff] }
 0x136   : > { %1052 = vst [vmem:[%s1573_s21 + $0x590] sm:$0xff] %v796_v50  ;;  %v817_v50 = vadd.f32 %v2928_v57, %v433_v44  ;;  %v454_v44 = vld [vmem:[%s1552_s5 + $0x6e0] sm:$0xff]  ;;  %v2949_v57 = vld [vmem:[#allocation54_spill] sm:$0xff] }
 0x137   : > { %1053 = vst [vmem:[%s1573_s21 + $0x598] sm:$0xff] %v797_v53  ;;  %v818_v53 = vadd.f32 %v2929_v45, %v434_v43  ;;  %v455_v43 = vld [vmem:[%s1552_s5 + $0x6e8] sm:$0xff]  ;;  %v2950_v45 = vld [vmem:[#allocation55_spill] sm:$0xff] }
 0x138   : > { %1054 = vst [vmem:[%s1573_s21 + $0x5a0] sm:$0xff] %v798_v56  ;;  %v819_v56 = vadd.f32 %v2930_v54, %v435_v52  ;;  %v456_v52 = vld [vmem:[%s1552_s5 + $0x6f0] sm:$0xff]  ;;  %v2951_v54 = vld [vmem:[#allocation56_spill] sm:$0xff] }
 0x139   : > { %1055 = vst [vmem:[%s1573_s21 + $0x5a8] sm:$0xff] %v799_v59  ;;  %v820_v59 = vadd.f32 %v2931_v11, %v436_v63  ;;  %v457_v63 = vld [vmem:[%s1552_s5 + $0x6f8] sm:$0xff]  ;;  %v2952_v11 = vld [vmem:[#allocation57_spill] sm:$0xff] }
 0x13a   : > { %1056 = vst [vmem:[%s1573_s21 + $0x5b0] sm:$0xff] %v800_v62  ;;  %v821_v62 = vadd.f32 %v2932_v13, %v437_v6  ;;  %v458_v6 = vld [vmem:[%s1552_s5 + $0x700] sm:$0xff]  ;;  %v2953_v13 = vld [vmem:[#allocation58_spill] sm:$0xff] }
 0x13b   : > { %1057 = vst [vmem:[%s1573_s21 + $0x5b8] sm:$0xff] %v801_v15  ;;  %v822_v15 = vadd.f32 %v2933_v1, %v438_v12  ;;  %v459_v12 = vld [vmem:[%s1552_s5 + $0x708] sm:$0xff]  ;;  %v2954_v1 = vld [vmem:[#allocation59_spill] sm:$0xff] }
 0x13c   : > { %1058 = vst [vmem:[%s1573_s21 + $0x5c0] sm:$0xff] %v802_v7  ;;  %v823_v7 = vadd.f32 %v2934_v31, %v439_v25  ;;  %v460_v25 = vld [vmem:[%s1552_s5 + $0x710] sm:$0xff]  ;;  %v2955_v31 = vld [vmem:[#allocation60_spill] sm:$0xff] }
 0x13d   : > { %1059 = vst [vmem:[%s1573_s21 + $0x5c8] sm:$0xff] %v803_v48  ;;  %v824_v48 = vadd.f32 %v2935_v10, %v440_v8  ;;  %v461_v8 = vld [vmem:[%s1552_s5 + $0x718] sm:$0xff]  ;;  %v2956_v10 = vld [vmem:[#allocation61_spill] sm:$0xff] }
 0x13e   : > { %1060 = vst [vmem:[%s1573_s21 + $0x5d0] sm:$0xff] %v804_v18  ;;  %v825_v18 = vadd.f32 %v2936_v22, %v441_v4  ;;  %v462_v4 = vld [vmem:[%s1552_s5 + $0x720] sm:$0xff]  ;;  %v2957_v22 = vld [vmem:[#allocation62_spill] sm:$0xff] }
 0x13f   : > { %1061 = vst [vmem:[%s1573_s21 + $0x5d8] sm:$0xff] %v805_v24  ;;  %v826_v24 = vadd.f32 %v2937_v23, %v442_v19  ;;  %v463_v19 = vld [vmem:[%s1552_s5 + $0x728] sm:$0xff]  ;;  %v2958_v23 = vld [vmem:[#allocation63_spill] sm:$0xff] }
 0x140   : > { %1062 = vst [vmem:[%s1573_s21 + $0x5e0] sm:$0xff] %v806_v33  ;;  %v827_v33 = vadd.f32 %v2938_v58, %v443_v14  ;;  %v464_v14 = vld [vmem:[%s1552_s5 + $0x730] sm:$0xff]  ;;  %v2959_v58 = vld [vmem:[#allocation64_spill] sm:$0xff] }
 0x141   : > { %1063 = vst [vmem:[%s1573_s21 + $0x5e8] sm:$0xff] %v807_v20  ;;  %v828_v20 = vadd.f32 %v2939_v37, %v444_v2  ;;  %v465_v2 = vld [vmem:[%s1552_s5 + $0x738] sm:$0xff]  ;;  %v2960_v37 = vld [vmem:[#allocation65_spill] sm:$0xff] }
 0x142   : > { %1064 = vst [vmem:[%s1573_s21 + $0x5f0] sm:$0xff] %v808_v46  ;;  %v829_v46 = vadd.f32 %v2940_v30, %v445_v28  ;;  %v466_v28 = vld [vmem:[%s1552_s5 + $0x740] sm:$0xff]  ;;  %v2961_v30 = vld [vmem:[#allocation66_spill] sm:$0xff] }
 0x143   : > { %1065 = vst [vmem:[%s1573_s21 + $0x5f8] sm:$0xff] %v809_v32  ;;  %v830_v32 = vadd.f32 %v2941_v51, %v446_v27  ;;  %v467_v27 = vld [vmem:[%s1552_s5 + $0x748] sm:$0xff]  ;;  %v2962_v51 = vld [vmem:[#allocation67_spill] sm:$0xff] }
 0x144   : > { %1066 = vst [vmem:[%s1573_s21 + $0x600] sm:$0xff] %v810_v60  ;;  %v831_v60 = vadd.f32 %v2942_v34, %v447_v42  ;;  %v468_v42 = vld [vmem:[%s1552_s5 + $0x750] sm:$0xff]  ;;  %v2963_v34 = vld [vmem:[#allocation68_spill] sm:$0xff] }
 0x145   : > { %1067 = vst [vmem:[%s1573_s21 + $0x608] sm:$0xff] %v811_v39  ;;  %v832_v39 = vadd.f32 %v2943_v0, %v448_v3  ;;  %v469_v3 = vld [vmem:[%s1552_s5 + $0x758] sm:$0xff]  ;;  %v2964_v0 = vld [vmem:[#allocation69_spill] sm:$0xff] }
 0x146   : > { %1068 = vst [vmem:[%s1573_s21 + $0x610] sm:$0xff] %v812_v9  ;;  %v833_v9 = vadd.f32 %v2944_v38, %v449_v55  ;;  %v470_v55 = vld [vmem:[%s1552_s5 + $0x760] sm:$0xff]  ;;  %v2965_v38 = vld [vmem:[#allocation70_spill] sm:$0xff] }
 0x147   : > { %1069 = vst [vmem:[%s1573_s21 + $0x618] sm:$0xff] %v813_v41  ;;  %v834_v41 = vadd.f32 %v2945_v16, %v450_v35  ;;  %v471_v35 = vld [vmem:[%s1552_s5 + $0x768] sm:$0xff]  ;;  %v2966_v16 = vld [vmem:[#allocation71_spill] sm:$0xff] }
 0x148   : > { %1070 = vst [vmem:[%s1573_s21 + $0x620] sm:$0xff] %v814_v29  ;;  %v835_v29 = vadd.f32 %v2946_v26, %v451_v5  ;;  %v472_v5 = vld [vmem:[%s1552_s5 + $0x770] sm:$0xff]  ;;  %v2967_v26 = vld [vmem:[#allocation72_spill] sm:$0xff] }
 0x149   : > { %1071 = vst [vmem:[%s1573_s21 + $0x628] sm:$0xff] %v815_v40  ;;  %v836_v40 = vadd.f32 %v2947_v36, %v452_v17  ;;  %v473_v17 = vld [vmem:[%s1552_s5 + $0x778] sm:$0xff]  ;;  %v2968_v36 = vld [vmem:[#allocation73_spill] sm:$0xff] }
 0x14a   : > { %1072 = vst [vmem:[%s1573_s21 + $0x630] sm:$0xff] %v816_v49  ;;  %v837_v49 = vadd.f32 %v2948_v47, %v453_v21  ;;  %v474_v21 = vld [vmem:[%s1552_s5 + $0x780] sm:$0xff]  ;;  %v2969_v47 = vld [vmem:[#allocation74_spill] sm:$0xff] }
 0x14b   : > { %1073 = vst [vmem:[%s1573_s21 + $0x638] sm:$0xff] %v817_v50  ;;  %v838_v50 = vadd.f32 %v2949_v57, %v454_v44  ;;  %v475_v44 = vld [vmem:[%s1552_s5 + $0x788] sm:$0xff]  ;;  %v2970_v57 = vld [vmem:[#allocation75_spill] sm:$0xff] }
 0x14c   : > { %1074 = vst [vmem:[%s1573_s21 + $0x640] sm:$0xff] %v818_v53  ;;  %v839_v53 = vadd.f32 %v2950_v45, %v455_v43  ;;  %v476_v43 = vld [vmem:[%s1552_s5 + $0x790] sm:$0xff]  ;;  %v2971_v45 = vld [vmem:[#allocation76_spill] sm:$0xff] }
 0x14d   : > { %1075 = vst [vmem:[%s1573_s21 + $0x648] sm:$0xff] %v819_v56  ;;  %v840_v56 = vadd.f32 %v2951_v54, %v456_v52  ;;  %v477_v52 = vld [vmem:[%s1552_s5 + $0x798] sm:$0xff]  ;;  %v2972_v54 = vld [vmem:[#allocation77_spill] sm:$0xff] }
 0x14e   : > { %1076 = vst [vmem:[%s1573_s21 + $0x650] sm:$0xff] %v820_v59  ;;  %v841_v59 = vadd.f32 %v2952_v11, %v457_v63  ;;  %v478_v63 = vld [vmem:[%s1552_s5 + $0x7a0] sm:$0xff]  ;;  %v2973_v11 = vld [vmem:[#allocation78_spill] sm:$0xff] }
 0x14f   : > { %1077 = vst [vmem:[%s1573_s21 + $0x658] sm:$0xff] %v821_v62  ;;  %v842_v62 = vadd.f32 %v2953_v13, %v458_v6  ;;  %v479_v6 = vld [vmem:[%s1552_s5 + $0x7a8] sm:$0xff]  ;;  %v2974_v13 = vld [vmem:[#allocation79_spill] sm:$0xff] }
 0x150   : > { %1078 = vst [vmem:[%s1573_s21 + $0x660] sm:$0xff] %v822_v15  ;;  %v843_v15 = vadd.f32 %v2954_v1, %v459_v12  ;;  %v480_v12 = vld [vmem:[%s1552_s5 + $0x7b0] sm:$0xff]  ;;  %v2975_v1 = vld [vmem:[#allocation80_spill] sm:$0xff] }
 0x151   : > { %1079 = vst [vmem:[%s1573_s21 + $0x668] sm:$0xff] %v823_v7  ;;  %v844_v7 = vadd.f32 %v2955_v31, %v460_v25  ;;  %v481_v25 = vld [vmem:[%s1552_s5 + $0x7b8] sm:$0xff]  ;;  %v2976_v31 = vld [vmem:[#allocation81_spill] sm:$0xff] }
 0x152   : > { %1080 = vst [vmem:[%s1573_s21 + $0x670] sm:$0xff] %v824_v48  ;;  %v845_v48 = vadd.f32 %v2956_v10, %v461_v8  ;;  %v482_v8 = vld [vmem:[%s1552_s5 + $0x7c0] sm:$0xff]  ;;  %v2977_v10 = vld [vmem:[#allocation82_spill] sm:$0xff] }
 0x153   : > { %1081 = vst [vmem:[%s1573_s21 + $0x678] sm:$0xff] %v825_v18  ;;  %v846_v18 = vadd.f32 %v2957_v22, %v462_v4  ;;  %v483_v4 = vld [vmem:[%s1552_s5 + $0x7c8] sm:$0xff]  ;;  %v2978_v22 = vld [vmem:[#allocation83_spill] sm:$0xff] }
 0x154   : > { %1082 = vst [vmem:[%s1573_s21 + $0x680] sm:$0xff] %v826_v24  ;;  %v847_v24 = vadd.f32 %v2958_v23, %v463_v19  ;;  %v484_v19 = vld [vmem:[%s1552_s5 + $0x7d0] sm:$0xff]  ;;  %v2979_v23 = vld [vmem:[#allocation84_spill] sm:$0xff] }
 0x155   : > { %1083 = vst [vmem:[%s1573_s21 + $0x688] sm:$0xff] %v827_v33  ;;  %v848_v33 = vadd.f32 %v2959_v58, %v464_v14  ;;  %v485_v14 = vld [vmem:[%s1552_s5 + $0x7d8] sm:$0xff]  ;;  %v2980_v58 = vld [vmem:[#allocation85_spill] sm:$0xff] }
 0x156   : > { %1084 = vst [vmem:[%s1573_s21 + $0x690] sm:$0xff] %v828_v20  ;;  %v849_v20 = vadd.f32 %v2960_v37, %v465_v2  ;;  %v486_v2 = vld [vmem:[%s1552_s5 + $0x7e0] sm:$0xff]  ;;  %v2981_v37 = vld [vmem:[#allocation86_spill] sm:$0xff] }
 0x157   : > { %1085 = vst [vmem:[%s1573_s21 + $0x698] sm:$0xff] %v829_v46  ;;  %v850_v46 = vadd.f32 %v2961_v30, %v466_v28  ;;  %v487_v28 = vld [vmem:[%s1552_s5 + $0x7e8] sm:$0xff] }
 0x158   : > { %1086 = vst [vmem:[%s1573_s21 + $0x6a0] sm:$0xff] %v830_v32  ;;  %v851_v32 = vadd.f32 %v2962_v51, %v467_v27  ;;  %v488_v27 = vld [vmem:[%s1552_s5 + $0x7f0] sm:$0xff]  ;;  %v871_v30 = vadd.f32 %v2298_v61, %v487_v28  ;;  %v2983_v51 = vld [vmem:[#allocation88_spill] sm:$0xff] }
 0x159   : > { %1087 = vst [vmem:[%s1573_s21 + $0x6a8] sm:$0xff] %v831_v60  ;;  %v852_v60 = vadd.f32 %v2963_v34, %v468_v42  ;;  %v489_v42 = vld [vmem:[%s1552_s5 + $0x7f8] sm:$0xff] }
 0x15a   : > { %1088 = vst [vmem:[%s1573_s21 + $0x6b0] sm:$0xff] %v832_v39  ;;  %v853_v39 = vadd.f32 %v2964_v0, %v469_v3 }
 0x15b   : > { %1089 = vst [vmem:[%s1573_s21 + $0x6b8] sm:$0xff] %v833_v9  ;;  %v854_v9 = vadd.f32 %v2965_v38, %v470_v55 }
 0x15c   : > { %1090 = vst [vmem:[%s1573_s21 + $0x6c0] sm:$0xff] %v834_v41  ;;  %v855_v41 = vadd.f32 %v2966_v16, %v471_v35 }
 0x15d   : > { %1091 = vst [vmem:[%s1573_s21 + $0x6c8] sm:$0xff] %v835_v29  ;;  %v856_v29 = vadd.f32 %v2967_v26, %v472_v5 }
 0x15e   : > { %1092 = vst [vmem:[%s1573_s21 + $0x6d0] sm:$0xff] %v836_v40  ;;  %v857_v40 = vadd.f32 %v2968_v36, %v473_v17 }
 0x15f   : > { %1093 = vst [vmem:[%s1573_s21 + $0x6d8] sm:$0xff] %v837_v49  ;;  %v858_v49 = vadd.f32 %v2969_v47, %v474_v21 }
 0x160   : > { %1094 = vst [vmem:[%s1573_s21 + $0x6e0] sm:$0xff] %v838_v50  ;;  %v859_v50 = vadd.f32 %v2970_v57, %v475_v44 }
 0x161   : > { %1095 = vst [vmem:[%s1573_s21 + $0x6e8] sm:$0xff] %v839_v53  ;;  %v860_v53 = vadd.f32 %v2971_v45, %v476_v43 }
 0x162   : > { %1096 = vst [vmem:[%s1573_s21 + $0x6f0] sm:$0xff] %v840_v56  ;;  %v861_v56 = vadd.f32 %v2972_v54, %v477_v52 }
 0x163   : > { %1097 = vst [vmem:[%s1573_s21 + $0x6f8] sm:$0xff] %v841_v59  ;;  %v862_v59 = vadd.f32 %v2973_v11, %v478_v63 }
 0x164   : > { %1098 = vst [vmem:[%s1573_s21 + $0x700] sm:$0xff] %v842_v62  ;;  %v863_v62 = vadd.f32 %v2974_v13, %v479_v6 }
 0x165   : > { %1099 = vst [vmem:[%s1573_s21 + $0x708] sm:$0xff] %v843_v15  ;;  %v864_v15 = vadd.f32 %v2975_v1, %v480_v12 }
 0x166   : > { %1100 = vst [vmem:[%s1573_s21 + $0x710] sm:$0xff] %v844_v7  ;;  %v865_v7 = vadd.f32 %v2976_v31, %v481_v25 }
 0x167   : > { %1101 = vst [vmem:[%s1573_s21 + $0x718] sm:$0xff] %v845_v48  ;;  %v866_v48 = vadd.f32 %v2977_v10, %v482_v8 }
 0x168   : > { %1102 = vst [vmem:[%s1573_s21 + $0x720] sm:$0xff] %v846_v18  ;;  %v867_v18 = vadd.f32 %v2978_v22, %v483_v4 }
 0x169   : > { %1103 = vst [vmem:[%s1573_s21 + $0x728] sm:$0xff] %v847_v24  ;;  %v868_v24 = vadd.f32 %v2979_v23, %v484_v19 }
 0x16a   : > { %1104 = vst [vmem:[%s1573_s21 + $0x730] sm:$0xff] %v848_v33  ;;  %v869_v33 = vadd.f32 %v2980_v58, %v485_v14 }
 0x16b   : > { %1105 = vst [vmem:[%s1573_s21 + $0x738] sm:$0xff] %v849_v20  ;;  %v870_v20 = vadd.f32 %v2981_v37, %v486_v2 }
 0x16c   : > { %1106 = vst [vmem:[%s1573_s21 + $0x740] sm:$0xff] %v850_v46  ;;  %v2982_v46 = vld [vmem:[#allocation87_spill] sm:$0xff] }
 0x16d   : > { %1107 = vst [vmem:[%s1573_s21 + $0x748] sm:$0xff] %v851_v32  ;;  %v872_v3 = vadd.f32 %v2982_v46, %v488_v27  ;;  %v873_v32 = vadd.f32 %v2983_v51, %v489_v42 }
 0x16e   : > { %1108 = vst [vmem:[%s1573_s21 + $0x750] sm:$0xff] %v852_v60 }
 0x16f   : > { %1109 = vst [vmem:[%s1573_s21 + $0x758] sm:$0xff] %v853_v39 }
 0x170   : > { %1110 = vst [vmem:[%s1573_s21 + $0x760] sm:$0xff] %v854_v9 }
 0x171   : > { %1111 = vst [vmem:[%s1573_s21 + $0x768] sm:$0xff] %v855_v41 }
 0x172   : > { %1112 = vst [vmem:[%s1573_s21 + $0x770] sm:$0xff] %v856_v29 }
 0x173   : > { %1113 = vst [vmem:[%s1573_s21 + $0x778] sm:$0xff] %v857_v40 }
 0x174   : > { %1114 = vst [vmem:[%s1573_s21 + $0x780] sm:$0xff] %v858_v49 }
 0x175   : > { %1115 = vst [vmem:[%s1573_s21 + $0x788] sm:$0xff] %v859_v50 }
 0x176   : > { %1116 = vst [vmem:[%s1573_s21 + $0x790] sm:$0xff] %v860_v53 }
 0x177   : > { %1117 = vst [vmem:[%s1573_s21 + $0x798] sm:$0xff] %v861_v56 }
 0x178   : > { %1118 = vst [vmem:[%s1573_s21 + $0x7a0] sm:$0xff] %v862_v59 }
 0x179   : > { %1119 = vst [vmem:[%s1573_s21 + $0x7a8] sm:$0xff] %v863_v62 }
 0x17a   : > { %1120 = vst [vmem:[%s1573_s21 + $0x7b0] sm:$0xff] %v864_v15 }
 0x17b   : > { %1121 = vst [vmem:[%s1573_s21 + $0x7b8] sm:$0xff] %v865_v7 }
 0x17c   : > { %1122 = vst [vmem:[%s1573_s21 + $0x7c0] sm:$0xff] %v866_v48 }
 0x17d   : > { %1123 = vst [vmem:[%s1573_s21 + $0x7c8] sm:$0xff] %v867_v18 }
 0x17e   : > { %1124 = vst [vmem:[%s1573_s21 + $0x7d0] sm:$0xff] %v868_v24 }
 0x17f   : > { %1125 = vst [vmem:[%s1573_s21 + $0x7d8] sm:$0xff] %v869_v33 }
 0x180   : > { %1126 = vst [vmem:[%s1573_s21 + $0x7e0] sm:$0xff] %v870_v20 }
 0x181   : > { %1127 = vst [vmem:[%s1573_s21 + $0x7e8] sm:$0xff] %v871_v30 }
 0x182   : > { %1128 = vst [vmem:[%s1573_s21 + $0x7f0] sm:$0xff] %v872_v3 }
 0x183   : > { %1129 = vst [vmem:[%s1573_s21 + $0x7f8] sm:$0xff] %v873_v32 }
 0x184   : > { %s1291_s15 = sshll.u32 %s1423_s12, 10  ;;  %s1156_s16 = sshll.u32 %s1573_s21, 4  ;;  %s1157_s16 = int_to_ptr.vmem [resolvable:$true] %s1156_s16 }
 0x185   : > { %s1145_s26 = scalar_lea.hbm %s2751_s2, %s1291_s15  ;;  %s1438_s28 = smov 16384  }
 0x186   : > { %s1158_s27 = sshll.u32 %s1145_s26, 4  ;;  %1301 = sst [smem:[#allocation9]] (%p1510_p9), %s1438_s28  ;;  %s1159_s27 = int_to_ptr.hbm [resolvable:$true] %s1158_s27 }
 0x187   : > { %s1439_s29 = smov 32768   ;;  %s1440_s30 = smov 128  }
 0x188   : > { %1302 = sst [smem:[#allocation9 + $0x1]] (%p1510_p9), %s1439_s29  ;;  %s1441_s12 = smov 8  }
 0x189   : > { %1303 = sst [smem:[#allocation9 + $0x2]] (%p1510_p9), %s1440_s30  ;;  %s1442_s3 = smov [#allocation8]  }
 0x18a   : > { %1304 = sst [smem:[#allocation9 + $0x3]] (%p1510_p9), %s1440_s30  ;;  %s1443_s5 = smov 0  }
 0x18b   : > { %1305 = sst [smem:[#allocation9 + $0x4]] (%p1510_p9), %s1440_s30 }
 0x18c   : > { %1306 = sst [smem:[#allocation9 + $0x5]] (%p1510_p9), %s1441_s12 }
 0x18d   : > { %1307 = dma.general (%p1510_p9), %s1157_s16, 32768, %s1159_s27, %s1131_s8, %s1442_s3, [#allocation9], %s1443_s5, 0  }
 0x18e PF: > { %s1186_s19 = sand.u32 1, %s1411_s9   ;;  %p1310_p3 = pnand %p1274_p12, %p1517_p11 }
 0x18f   : > { %s1187_s25 = scalar_lea.sflag [#allocation4], %s1186_s19 }
 0x190   : > { %p1311_p4 = pneg %p1310_p3 }
 0x192   : > { %1406 = dma.done.wait (%p1311_p4), %s1187_s25, 32768  }
 0x193   : > { %1408 = vsyncadd (%p1311_p4), %s1187_s25, 4294934528  ;;  %s18_s14 = sadd.s32 1, %s1431_s14   ;;  %s2984_s9 = smov %s1415_s10 }
 0x194   : > { %p15_p5 = scmp.ge.s32.totalorder %s18_s14, 4   ;;  %s2985_s10 = smov %s1419_s11 }
 0x195   : > { %s2986_s11 = smov %s1515_s23  ;;  %s2987_s12 = smov %s1427_s13 }
 0x196   : > { %s2988_s13 = smov %s2990_s17  ;;  %17 = sbr.rel (!%p15_p5) target bundleno = 6 (0x6), region = 86 }
 0x19b   :  { %1193 = vsyncpa [#allocation3], 1 }
 0x19c   :  { %1195 = vsyncpa [#allocation3 + $0x1], 1 }
 0x19d   :  { %1196 = vsyncpa [#allocation4], 1 }
 0x19e   :  { %1198 = vsyncpa [#allocation4 + $0x1], 1 }

</bundles_post_ra>
